<compile_context>
chip_gen: v6e
topology: v6e:2x2x1
jax: 0.10.0
libtpu: 0.0.40
codegen_flags: <defaults>
</compile_context>

<pallas_src>
import numpy as np
import jax
import jax.numpy as jnp
from jax import lax
from jax.experimental import pallas as pl
from jax.experimental.pallas import tpu as pltpu

BN_EPS = 1e-5
LRELU_SLOPE = 0.2

H_IN = 28        # input spatial size
QG = 7           # 4x4 space-to-depth grid: 28 / 4
G1 = 8           # padded per-sample (u, v) grid used by layers 1 & 2
H1 = 13          # conv1 output spatial size
H2 = 5           # conv2 output spatial size
GUARD = 16       # zero guard rows so the +{1,8,9} shifted reads stay in bounds
SHIFTS = (0, 1, 8, 9)   # row offsets realizing (du, dv) in {0,1}^2 on the 8-wide grid


# ------------------------------ fused kernel --------------------------------

def _make_kernel(n):
    rows = n * G1 * G1               # (sample, u, v) rows, 64 per sample
    inv_cnt1 = 1.0 / (n * H1 * H1)   # valid conv1 positions (BN denominator)
    inv_cnt2 = 1.0 / (n * H2 * H2)   # valid conv2 positions
    f32 = jnp.float32

    def chan_stat(row64):
        # (1,64) per-(p',q',c) sums -> per-channel sums broadcast back to 64 lanes.
        s16 = (row64[:, 0:16] + row64[:, 16:32]
               + row64[:, 32:48] + row64[:, 48:64])
        return jnp.concatenate([s16, s16, s16, s16], axis=1)

    def kernel(xq_ref, w1_ref, b1_ref, g1_ref, be1_ref,
               w2_ref, b2_ref, g2_ref, be2_ref,
               w3_ref, b3_ref, o_ref, act_buf):
        # ---- layer 1: Conv(1->16, k4, s2) + BN + LeakyReLU -----------------
        # xq rows = (n, u, v) on the padded 8x8 quad grid, lanes = 16 in-quad
        # offsets (r, t).  The shifted reads give the (du, dv) taps; w1_ref[g]
        # already folds kernel taps and output parities, so
        # y1[(n,u,v), (p',q',c)] = conv1(n, 2u+p', 2v+q', c).
        y1 = jnp.dot(xq_ref[pl.ds(SHIFTS[0], rows), :], w1_ref[0],
                     preferred_element_type=f32)
        for g in range(1, 4):
            y1 = y1 + jnp.dot(xq_ref[pl.ds(SHIFTS[g], rows), :], w1_ref[g],
                              preferred_element_type=f32)
        y1 = y1 + b1_ref[...]

        # Valid conv1 positions: h1 = 2u + p' <= 12 and w1 = 2v + q' <= 12.
        ridx = lax.broadcasted_iota(jnp.int32, (rows, 64), 0)
        lidx = lax.broadcasted_iota(jnp.int32, (rows, 64), 1)
        h1i = 2 * ((ridx >> 3) & 7) + (lidx >> 5)
        w1i = 2 * (ridx & 7) + ((lidx >> 4) & 1)
        mask1 = jnp.logical_and(h1i <= H1 - 1, w1i <= H1 - 1)

        mean1 = chan_stat(jnp.sum(jnp.where(mask1, y1, 0.0),
                                  axis=0, keepdims=True)) * inv_cnt1
        d1 = y1 - mean1
        var1 = chan_stat(jnp.sum(jnp.where(mask1, d1 * d1, 0.0),
                                 axis=0, keepdims=True)) * inv_cnt1
        a1 = d1 * (lax.rsqrt(var1 + BN_EPS) * g1_ref[...]) + be1_ref[...]
        act1 = jnp.where(a1 > 0, a1, LRELU_SLOPE * a1)

        # Stash act1 plus zero guard rows so layer 2's stride-2 taps become
        # plain static row-offset reads (no lane-misaligned concats).
        act_buf[pl.ds(0, rows), :] = act1
        act_buf[pl.ds(rows, GUARD), :] = jnp.zeros((GUARD, 64), f32)

        # ---- layer 2: Conv(16->32, k4, s2) + BN + LeakyReLU ----------------
        y2 = jnp.dot(act_buf[pl.ds(SHIFTS[0], rows), :], w2_ref[0],
                     preferred_element_type=f32)
        for s in range(1, 4):
            y2 = y2 + jnp.dot(act_buf[pl.ds(SHIFTS[s], rows), :], w2_ref[s],
                              preferred_element_type=f32)
        y2 = y2 + b2_ref[...]

        # Valid conv2 positions: h2 <= 4 and w2 <= 4 on the padded 8x8 grid.
        ridx2 = lax.broadcasted_iota(jnp.int32, (rows, 32), 0)
        mask2 = jnp.logical_and(((ridx2 >> 3) & 7) <= H2 - 1,
                                (ridx2 & 7) <= H2 - 1)

        mean2 = jnp.sum(jnp.where(mask2, y2, 0.0),
                        axis=0, keepdims=True) * inv_cnt2
        d2 = y2 - mean2
        var2 = jnp.sum(jnp.where(mask2, d2 * d2, 0.0),
                       axis=0, keepdims=True) * inv_cnt2
        a2 = d2 * (lax.rsqrt(var2 + BN_EPS) * g2_ref[...]) + be2_ref[...]
        act2 = jnp.where(a2 > 0, a2, LRELU_SLOPE * a2)

        # ---- layer 3: Conv(32->1, k4, s2) as masked VPU multiply-reduce ----
        # w3_ref is a (64, 32) per-(h2, w2) weight map (zero on padded rows).
        prod = act2.reshape(n, G1 * G1, 32) * w3_ref[...]
        out = jnp.sum(jnp.sum(prod, axis=2, keepdims=True), axis=1)   # (n, 1)
        o_ref[...] = out + b3_ref[...]

    return kernel


# --------------------------------- wrapper ----------------------------------

def discriminator_forward(image, params):
    n = image.shape[0]
    assert image.shape[1:] == (1, H_IN, H_IN), image.shape
    rows = n * G1 * G1

    # Only XLA-side prep on the activation path: 4x4 space-to-depth of the raw
    # image (no inflation), padded 7->8 per axis, plus zero guard rows.
    x = jnp.transpose(image.reshape(n, QG, 4, QG, 4).astype(jnp.float32),
                      (0, 1, 3, 2, 4)).reshape(n, QG, QG, 16)
    x = jnp.pad(x, ((0, 0), (0, G1 - QG), (0, G1 - QG), (0, 0)))
    xq = jnp.pad(x.reshape(rows, 16), ((0, GUARD), (0, 0)))

    kernel = _make_kernel(n)
    args = (xq, params["w1"], params["b1"], params["g1"], params["be1"],
            params["w2"], params["b2"], params["g2"], params["be2"],
            params["w3"], params["b3"])
    vmem = pl.BlockSpec(memory_space=pltpu.MemorySpace.VMEM)
    flops = 2 * rows * (4 * 16 * 64 + 4 * 64 * 32 + 32)
    bytes_accessed = 4 * (sum(int(a.size) for a in args) + n)
    # NOTE: for non-trivial batch sizes, add a batch grid
    # (dimension_semantics=("parallel",)) with a cross-block BN reduction to
    # use v7x's second TensorCore and bound per-step VMEM; not worth it at n=2.
    return pl.pallas_call(
        kernel,
        in_specs=[vmem] * len(args),
        out_specs=vmem,
        out_shape=jax.ShapeDtypeStruct((n, 1), jnp.float32),
        scratch_shapes=[pltpu.VMEM((rows + GUARD, 64), jnp.float32)],
        cost_estimate=pl.CostEstimate(flops=flops, transcendentals=96,
                                      bytes_accessed=bytes_accessed),
    )(*args)


# ----------------------------- parameter prep -------------------------------

def prep_params(raw):
    """Re-arrange PyTorch-layout weights for the kernel (host-side, one-off)."""
    w1 = np.asarray(raw["w1"], np.float32).reshape(16, 4, 4)     # (c, i, j)
    w2 = np.asarray(raw["w2"], np.float32)                       # (cout, cin, i, j)
    w3 = np.asarray(raw["w3"], np.float32)                       # (1, cin, i, j)

    # Layer 1: (shift g=(du,dv), quad-offset k=(r,t)) -> lane L=(p',q',c).
    # Tap (i, j) satisfies 2p'+i = 4du+r and 2q'+j = 4dv+t.
    w1big = np.zeros((4, 16, 64), np.float32)
    for du in range(2):
        for dv in range(2):
            g = 2 * du + dv
            for r in range(4):
                for t in range(4):
                    k = 4 * r + t
                    for p in range(2):
                        for q in range(2):
                            i = 4 * du + r - 2 * p
                            j = 4 * dv + t - 2 * q
                            if 0 <= i < 4 and 0 <= j < 4:
                                base = 32 * p + 16 * q
                                w1big[g, k, base:base + 16] = w1[:, i, j]

    # Layer 2: (shift s=(a,b), K=(p',q',cin)) -> cout; tap (i,j)=(2a+p', 2b+q').
    w2big = np.zeros((4, 64, 32), np.float32)
    for a in range(2):
        for b in range(2):
            s = 2 * a + b
            for p in range(2):
                for q in range(2):
                    base = 32 * p + 16 * q
                    w2big[s, base:base + 16, :] = w2[:, :, 2 * a + p, 2 * b + q].T

    # Layer 3: per-position weight map on the padded 8x8 conv2 output grid.
    w3map = np.zeros((64, 32), np.float32)
    for i in range(4):
        for j in range(4):
            w3map[8 * i + j, :] = w3[0, :, i, j]

    tile4 = lambda v: np.tile(np.asarray(v, np.float32), 4).reshape(1, 64)
    row = lambda v: np.asarray(v, np.float32).reshape(1, -1)
    return {
        "w1": jnp.asarray(w1big), "b1": jnp.asarray(tile4(raw["b1"])),
        "g1": jnp.asarray(tile4(raw["g1"])), "be1": jnp.asarray(tile4(raw["be1"])),
        "w2": jnp.asarray(w2big), "b2": jnp.asarray(row(raw["b2"])),
        "g2": jnp.asarray(row(raw["g2"])), "be2": jnp.asarray(row(raw["be2"])),
        "w3": jnp.asarray(w3map), "b3": jnp.asarray(row(raw["b3"])),
    }


def init_params(key):
    """Deterministic synthetic init matching the module's init scheme/shapes."""
    ks = jax.random.split(key, 8)
    return {
        "w1": 0.02 * jax.random.normal(ks[0], (16, 1, 4, 4), jnp.float32),
        "w2": 0.02 * jax.random.normal(ks[1], (32, 16, 4, 4), jnp.float32),
        "w3": 0.02 * jax.random.normal(ks[2], (1, 32, 4, 4), jnp.float32),
        "b1": 0.01 * jax.random.normal(ks[3], (16,), jnp.float32),
        "b2": 0.01 * jax.random.normal(ks[4], (32,), jnp.float32),
        "b3": 0.01 * jax.random.normal(ks[5], (1,), jnp.float32),
        "g1": 0.02 * jax.random.normal(ks[6], (16,), jnp.float32),
        "g2": 0.02 * jax.random.normal(ks[7], (32,), jnp.float32),
        "be1": jnp.zeros((16,), jnp.float32),
        "be2": jnp.zeros((32,), jnp.float32),
    }


# ------------------------------- reference ----------------------------------

def _reference_forward(image, raw):
    """Pure-JAX/XLA reference with PyTorch-equivalent math."""
    def conv(x, w, b):
        y = lax.conv_general_dilated(
            x, w, window_strides=(2, 2), padding="VALID",
            dimension_numbers=("NCHW", "OIHW", "NCHW"),
            precision=lax.Precision.HIGHEST)
        return y + b.reshape(1, -1, 1, 1)

    def bn_lrelu(y, g, be):
        m = jnp.mean(y, axis=(0, 2, 3), keepdims=True)
        v = jnp.mean(jnp.square(y - m), axis=(0, 2, 3), keepdims=True)
        y = (y - m) * lax.rsqrt(v + BN_EPS) * g.reshape(1, -1, 1, 1) \
            + be.reshape(1, -1, 1, 1)
        return jnp.where(y > 0, y, LRELU_SLOPE * y)

    x = image.astype(jnp.float32)
    x = bn_lrelu(conv(x, raw["w1"], raw["b1"]), raw["g1"], raw["be1"])
    x = bn_lrelu(conv(x, raw["w2"], raw["b2"]), raw["g2"], raw["be2"])
    x = conv(x, raw["w3"], raw["b3"])
    return x.reshape(x.shape[0], -1)


if __name__ == "__main__":
    key = jax.random.PRNGKey(0)
    pkey, xkey = jax.random.split(key)
    raw = init_params(pkey)
    params = prep_params(raw)

    # MNIST-like input: 28x28 -> 13x13 -> 5x5 -> 1x1, final output (N, 1).
    image = jax.random.normal(xkey, (2, 1, 28, 28), jnp.float32)

    out = jax.jit(discriminator_forward)(image, params)
    out = jax.block_until_ready(out)

    ref = _reference_forward(image, raw)
    assert out.shape == (2, 1), out.shape
    assert bool(jnp.all(jnp.isfinite(out)))
    assert bool(jnp.allclose(out, ref, rtol=1e-3, atol=1e-4)), (out, ref)
    print("KERNEL_OK")
</pallas_src>

<mosaic_0001>
module attributes {stable_mosaic.version = 11 : i64} {
  func.func @kernel(%arg0: memref<144x16xf32, #tpu.memory_space<vmem>>, %arg1: memref<4x16x64xf32, #tpu.memory_space<vmem>>, %arg2: memref<1x64xf32, #tpu.memory_space<vmem>>, %arg3: memref<1x64xf32, #tpu.memory_space<vmem>>, %arg4: memref<1x64xf32, #tpu.memory_space<vmem>>, %arg5: memref<4x64x32xf32, #tpu.memory_space<vmem>>, %arg6: memref<1x32xf32, #tpu.memory_space<vmem>>, %arg7: memref<1x32xf32, #tpu.memory_space<vmem>>, %arg8: memref<1x32xf32, #tpu.memory_space<vmem>>, %arg9: memref<64x32xf32, #tpu.memory_space<vmem>>, %arg10: memref<1x1xf32, #tpu.memory_space<vmem>>, %arg11: memref<2x1xf32, #tpu.memory_space<vmem>>, %arg12: memref<144x64xf32, #tpu.memory_space<vmem>>) attributes {dimension_semantics = [], scalar_prefetch = 0 : i64, scratch_operands = 1 : i64, tpu.core_type = #tpu.core_type<tc>} {
    %c0 = arith.constant 0 : index
    %c0_0 = arith.constant 0 : index
    %0 = vector.load %arg0[%c0, %c0_0] : memref<144x16xf32, #tpu.memory_space<vmem>>, vector<128x16xf32>
    %c0_1 = arith.constant 0 : index
    %c0_2 = arith.constant 0 : index
    %c0_3 = arith.constant 0 : index
    %1 = vector.load %arg1[%c0_1, %c0_2, %c0_3] : memref<4x16x64xf32, #tpu.memory_space<vmem>>, vector<1x16x64xf32>
    %2 = vector.shape_cast %1 : vector<1x16x64xf32> to vector<16x64xf32>
    %cst = arith.constant dense<0.000000e+00> : vector<128x64xf32>
    %3 = tpu.matmul %0, %2, %cst {dimension_numbers = #tpu.dot_dimension_numbers<[1], [0], [0], [1], [0, 0, 1, 1], [], []>} : vector<128x16xf32>, vector<16x64xf32>, vector<128x64xf32> -> vector<128x64xf32>
    %c1 = arith.constant 1 : index
    %c0_4 = arith.constant 0 : index
    %4 = vector.load %arg0[%c1, %c0_4] : memref<144x16xf32, #tpu.memory_space<vmem>>, vector<128x16xf32>
    %c1_5 = arith.constant 1 : index
    %c0_6 = arith.constant 0 : index
    %c0_7 = arith.constant 0 : index
    %5 = vector.load %arg1[%c1_5, %c0_6, %c0_7] : memref<4x16x64xf32, #tpu.memory_space<vmem>>, vector<1x16x64xf32>
    %6 = vector.shape_cast %5 : vector<1x16x64xf32> to vector<16x64xf32>
    %cst_8 = arith.constant dense<0.000000e+00> : vector<128x64xf32>
    %7 = tpu.matmul %4, %6, %cst_8 {dimension_numbers = #tpu.dot_dimension_numbers<[1], [0], [0], [1], [0, 0, 1, 1], [], []>} : vector<128x16xf32>, vector<16x64xf32>, vector<128x64xf32> -> vector<128x64xf32>
    %8 = arith.addf %3, %7 : vector<128x64xf32>
    %c8 = arith.constant 8 : index
    %c0_9 = arith.constant 0 : index
    %9 = vector.load %arg0[%c8, %c0_9] : memref<144x16xf32, #tpu.memory_space<vmem>>, vector<128x16xf32>
    %c2 = arith.constant 2 : index
    %c0_10 = arith.constant 0 : index
    %c0_11 = arith.constant 0 : index
    %10 = vector.load %arg1[%c2, %c0_10, %c0_11] : memref<4x16x64xf32, #tpu.memory_space<vmem>>, vector<1x16x64xf32>
    %11 = vector.shape_cast %10 : vector<1x16x64xf32> to vector<16x64xf32>
    %cst_12 = arith.constant dense<0.000000e+00> : vector<128x64xf32>
    %12 = tpu.matmul %9, %11, %cst_12 {dimension_numbers = #tpu.dot_dimension_numbers<[1], [0], [0], [1], [0, 0, 1, 1], [], []>} : vector<128x16xf32>, vector<16x64xf32>, vector<128x64xf32> -> vector<128x64xf32>
    %13 = arith.addf %8, %12 : vector<128x64xf32>
    %c9 = arith.constant 9 : index
    %c0_13 = arith.constant 0 : index
    %14 = vector.load %arg0[%c9, %c0_13] : memref<144x16xf32, #tpu.memory_space<vmem>>, vector<128x16xf32>
    %c3 = arith.constant 3 : index
    %c0_14 = arith.constant 0 : index
    %c0_15 = arith.constant 0 : index
    %15 = vector.load %arg1[%c3, %c0_14, %c0_15] : memref<4x16x64xf32, #tpu.memory_space<vmem>>, vector<1x16x64xf32>
    %16 = vector.shape_cast %15 : vector<1x16x64xf32> to vector<16x64xf32>
    %cst_16 = arith.constant dense<0.000000e+00> : vector<128x64xf32>
    %17 = tpu.matmul %14, %16, %cst_16 {dimension_numbers = #tpu.dot_dimension_numbers<[1], [0], [0], [1], [0, 0, 1, 1], [], []>} : vector<128x16xf32>, vector<16x64xf32>, vector<128x64xf32> -> vector<128x64xf32>
    %18 = arith.addf %13, %17 : vector<128x64xf32>
    %c0_17 = arith.constant 0 : index
    %c0_18 = arith.constant 0 : index
    %19 = vector.load %arg2[%c0_17, %c0_18] : memref<1x64xf32, #tpu.memory_space<vmem>>, vector<1x64xf32>
    %20 = vector.broadcast %19 : vector<1x64xf32> to vector<128x64xf32>
    %21 = arith.addf %18, %20 : vector<128x64xf32>
    %22 = tpu.iota {dimensions = array<i32: 0>} : vector<128x64xi32>
    %23 = tpu.iota {dimensions = array<i32: 1>} : vector<128x64xi32>
    %c3_i32 = arith.constant 3 : i32
    %24 = vector.broadcast %c3_i32 : i32 to vector<128x64xi32>
    %25 = arith.shrsi %22, %24 : vector<128x64xi32>
    %c7_i32 = arith.constant 7 : i32
    %26 = vector.broadcast %c7_i32 : i32 to vector<128x64xi32>
    %27 = arith.andi %25, %26 : vector<128x64xi32>
    %c2_i32 = arith.constant 2 : i32
    %28 = vector.broadcast %c2_i32 : i32 to vector<128x64xi32>
    %29 = arith.muli %28, %27 : vector<128x64xi32>
    %c5_i32 = arith.constant 5 : i32
    %30 = vector.broadcast %c5_i32 : i32 to vector<128x64xi32>
    %31 = arith.shrsi %23, %30 : vector<128x64xi32>
    %32 = arith.addi %29, %31 : vector<128x64xi32>
    %c7_i32_19 = arith.constant 7 : i32
    %33 = vector.broadcast %c7_i32_19 : i32 to vector<128x64xi32>
    %34 = arith.andi %22, %33 : vector<128x64xi32>
    %c2_i32_20 = arith.constant 2 : i32
    %35 = vector.broadcast %c2_i32_20 : i32 to vector<128x64xi32>
    %36 = arith.muli %35, %34 : vector<128x64xi32>
    %c4_i32 = arith.constant 4 : i32
    %37 = vector.broadcast %c4_i32 : i32 to vector<128x64xi32>
    %38 = arith.shrsi %23, %37 : vector<128x64xi32>
    %c1_i32 = arith.constant 1 : i32
    %39 = vector.broadcast %c1_i32 : i32 to vector<128x64xi32>
    %40 = arith.andi %38, %39 : vector<128x64xi32>
    %41 = arith.addi %36, %40 : vector<128x64xi32>
    %c12_i32 = arith.constant 12 : i32
    %42 = vector.broadcast %c12_i32 : i32 to vector<128x64xi32>
    %43 = arith.cmpi sle, %32, %42 : vector<128x64xi32>
    %c12_i32_21 = arith.constant 12 : i32
    %44 = vector.broadcast %c12_i32_21 : i32 to vector<128x64xi32>
    %45 = arith.cmpi sle, %41, %44 : vector<128x64xi32>
    %46 = arith.andi %43, %45 : vector<128x64xi1>
    %cst_22 = arith.constant 0.000000e+00 : f32
    %47 = vector.broadcast %cst_22 : f32 to vector<128x64xf32>
    %48 = arith.select %46, %21, %47 : vector<128x64xi1>, vector<128x64xf32>
    %cst_23 = arith.constant dense<0.000000e+00> : vector<64xf32>
    %49 = vector.multi_reduction <add>, %48, %cst_23 [0] : vector<128x64xf32> to vector<64xf32>
    %50 = vector.shape_cast %49 : vector<64xf32> to vector<1x64xf32>
    %51 = vector.extract_strided_slice %50 {offsets = [0, 0], sizes = [1, 16], strides = [1, 1]} : vector<1x64xf32> to vector<1x16xf32>
    %52 = vector.extract_strided_slice %50 {offsets = [0, 16], sizes = [1, 16], strides = [1, 1]} : vector<1x64xf32> to vector<1x16xf32>
    %53 = arith.addf %51, %52 : vector<1x16xf32>
    %54 = vector.extract_strided_slice %50 {offsets = [0, 32], sizes = [1, 16], strides = [1, 1]} : vector<1x64xf32> to vector<1x16xf32>
    %55 = arith.addf %53, %54 : vector<1x16xf32>
    %56 = vector.extract_strided_slice %50 {offsets = [0, 48], sizes = [1, 16], strides = [1, 1]} : vector<1x64xf32> to vector<1x16xf32>
    %57 = arith.addf %55, %56 : vector<1x16xf32>
    %58 = tpu.concatenate %57, %57, %57, %57 in 1 : vector<1x16xf32>, vector<1x16xf32>, vector<1x16xf32>, vector<1x16xf32> -> vector<1x64xf32>
    %cst_24 = arith.constant 2.958580e-03 : f32
    %59 = vector.broadcast %cst_24 : f32 to vector<1x64xf32>
    %60 = arith.mulf %58, %59 : vector<1x64xf32>
    %61 = vector.broadcast %60 : vector<1x64xf32> to vector<128x64xf32>
    %62 = arith.subf %21, %61 : vector<128x64xf32>
    %63 = arith.mulf %62, %62 : vector<128x64xf32>
    %cst_25 = arith.constant 0.000000e+00 : f32
    %64 = vector.broadcast %cst_25 : f32 to vector<128x64xf32>
    %65 = arith.select %46, %63, %64 : vector<128x64xi1>, vector<128x64xf32>
    %cst_26 = arith.constant dense<0.000000e+00> : vector<64xf32>
    %66 = vector.multi_reduction <add>, %65, %cst_26 [0] : vector<128x64xf32> to vector<64xf32>
    %67 = vector.shape_cast %66 : vector<64xf32> to vector<1x64xf32>
    %68 = vector.extract_strided_slice %67 {offsets = [0, 0], sizes = [1, 16], strides = [1, 1]} : vector<1x64xf32> to vector<1x16xf32>
    %69 = vector.extract_strided_slice %67 {offsets = [0, 16], sizes = [1, 16], strides = [1, 1]} : vector<1x64xf32> to vector<1x16xf32>
    %70 = arith.addf %68, %69 : vector<1x16xf32>
    %71 = vector.extract_strided_slice %67 {offsets = [0, 32], sizes = [1, 16], strides = [1, 1]} : vector<1x64xf32> to vector<1x16xf32>
    %72 = arith.addf %70, %71 : vector<1x16xf32>
    %73 = vector.extract_strided_slice %67 {offsets = [0, 48], sizes = [1, 16], strides = [1, 1]} : vector<1x64xf32> to vector<1x16xf32>
    %74 = arith.addf %72, %73 : vector<1x16xf32>
    %75 = tpu.concatenate %74, %74, %74, %74 in 1 : vector<1x16xf32>, vector<1x16xf32>, vector<1x16xf32>, vector<1x16xf32> -> vector<1x64xf32>
    %cst_27 = arith.constant 2.958580e-03 : f32
    %76 = vector.broadcast %cst_27 : f32 to vector<1x64xf32>
    %77 = arith.mulf %75, %76 : vector<1x64xf32>
    %cst_28 = arith.constant 9.99999974E-6 : f32
    %78 = vector.broadcast %cst_28 : f32 to vector<1x64xf32>
    %79 = arith.addf %77, %78 : vector<1x64xf32>
    %80 = math.rsqrt %79 : vector<1x64xf32>
    %c0_29 = arith.constant 0 : index
    %c0_30 = arith.constant 0 : index
    %81 = vector.load %arg3[%c0_29, %c0_30] : memref<1x64xf32, #tpu.memory_space<vmem>>, vector<1x64xf32>
    %82 = arith.mulf %80, %81 : vector<1x64xf32>
    %83 = vector.broadcast %82 : vector<1x64xf32> to vector<128x64xf32>
    %84 = arith.mulf %62, %83 : vector<128x64xf32>
    %c0_31 = arith.constant 0 : index
    %c0_32 = arith.constant 0 : index
    %85 = vector.load %arg4[%c0_31, %c0_32] : memref<1x64xf32, #tpu.memory_space<vmem>>, vector<1x64xf32>
    %86 = vector.broadcast %85 : vector<1x64xf32> to vector<128x64xf32>
    %87 = arith.addf %84, %86 : vector<128x64xf32>
    %cst_33 = arith.constant 0.000000e+00 : f32
    %88 = vector.broadcast %cst_33 : f32 to vector<128x64xf32>
    %89 = arith.cmpf ogt, %87, %88 : vector<128x64xf32>
    %cst_34 = arith.constant 2.000000e-01 : f32
    %90 = vector.broadcast %cst_34 : f32 to vector<128x64xf32>
    %91 = arith.mulf %90, %87 : vector<128x64xf32>
    %92 = arith.select %89, %87, %91 : vector<128x64xi1>, vector<128x64xf32>
    %c0_35 = arith.constant 0 : index
    %c0_36 = arith.constant 0 : index
    %93 = vector.load %arg12[%c0_35, %c0_36] : memref<144x64xf32, #tpu.memory_space<vmem>>, vector<128x64xf32>
    tpu.vector_store %arg12[%c0_35, %c0_36], %92 {strides = array<i32>} : memref<144x64xf32, #tpu.memory_space<vmem>>, vector<128x64xf32>,
    %cst_37 = arith.constant 0.000000e+00 : f32
    %94 = vector.broadcast %cst_37 : f32 to vector<16x64xf32>
    %c128 = arith.constant 128 : index
    %c0_38 = arith.constant 0 : index
    %95 = vector.load %arg12[%c128, %c0_38] : memref<144x64xf32, #tpu.memory_space<vmem>>, vector<16x64xf32>
    tpu.vector_store %arg12[%c128, %c0_38], %94 {strides = array<i32>} : memref<144x64xf32, #tpu.memory_space<vmem>>, vector<16x64xf32>,
    %c0_39 = arith.constant 0 : index
    %c0_40 = arith.constant 0 : index
    %96 = vector.load %arg12[%c0_39, %c0_40] : memref<144x64xf32, #tpu.memory_space<vmem>>, vector<128x64xf32>
    %c0_41 = arith.constant 0 : index
    %c0_42 = arith.constant 0 : index
    %c0_43 = arith.constant 0 : index
    %97 = vector.load %arg5[%c0_41, %c0_42, %c0_43] : memref<4x64x32xf32, #tpu.memory_space<vmem>>, vector<1x64x32xf32>
    %98 = vector.shape_cast %97 : vector<1x64x32xf32> to vector<64x32xf32>
    %cst_44 = arith.constant dense<0.000000e+00> : vector<128x32xf32>
    %99 = tpu.matmul %96, %98, %cst_44 {dimension_numbers = #tpu.dot_dimension_numbers<[1], [0], [0], [1], [0, 0, 1, 1], [], []>} : vector<128x64xf32>, vector<64x32xf32>, vector<128x32xf32> -> vector<128x32xf32>
    %c1_45 = arith.constant 1 : index
    %c0_46 = arith.constant 0 : index
    %100 = vector.load %arg12[%c1_45, %c0_46] : memref<144x64xf32, #tpu.memory_space<vmem>>, vector<128x64xf32>
    %c1_47 = arith.constant 1 : index
    %c0_48 = arith.constant 0 : index
    %c0_49 = arith.constant 0 : index
    %101 = vector.load %arg5[%c1_47, %c0_48, %c0_49] : memref<4x64x32xf32, #tpu.memory_space<vmem>>, vector<1x64x32xf32>
    %102 = vector.shape_cast %101 : vector<1x64x32xf32> to vector<64x32xf32>
    %cst_50 = arith.constant dense<0.000000e+00> : vector<128x32xf32>
    %103 = tpu.matmul %100, %102, %cst_50 {dimension_numbers = #tpu.dot_dimension_numbers<[1], [0], [0], [1], [0, 0, 1, 1], [], []>} : vector<128x64xf32>, vector<64x32xf32>, vector<128x32xf32> -> vector<128x32xf32>
    %104 = arith.addf %99, %103 : vector<128x32xf32>
    %c8_51 = arith.constant 8 : index
    %c0_52 = arith.constant 0 : index
    %105 = vector.load %arg12[%c8_51, %c0_52] : memref<144x64xf32, #tpu.memory_space<vmem>>, vector<128x64xf32>
    %c2_53 = arith.constant 2 : index
    %c0_54 = arith.constant 0 : index
    %c0_55 = arith.constant 0 : index
    %106 = vector.load %arg5[%c2_53, %c0_54, %c0_55] : memref<4x64x32xf32, #tpu.memory_space<vmem>>, vector<1x64x32xf32>
    %107 = vector.shape_cast %106 : vector<1x64x32xf32> to vector<64x32xf32>
    %cst_56 = arith.constant dense<0.000000e+00> : vector<128x32xf32>
    %108 = tpu.matmul %105, %107, %cst_56 {dimension_numbers = #tpu.dot_dimension_numbers<[1], [0], [0], [1], [0, 0, 1, 1], [], []>} : vector<128x64xf32>, vector<64x32xf32>, vector<128x32xf32> -> vector<128x32xf32>
    %109 = arith.addf %104, %108 : vector<128x32xf32>
    %c9_57 = arith.constant 9 : index
    %c0_58 = arith.constant 0 : index
    %110 = vector.load %arg12[%c9_57, %c0_58] : memref<144x64xf32, #tpu.memory_space<vmem>>, vector<128x64xf32>
    %c3_59 = arith.constant 3 : index
    %c0_60 = arith.constant 0 : index
    %c0_61 = arith.constant 0 : index
    %111 = vector.load %arg5[%c3_59, %c0_60, %c0_61] : memref<4x64x32xf32, #tpu.memory_space<vmem>>, vector<1x64x32xf32>
    %112 = vector.shape_cast %111 : vector<1x64x32xf32> to vector<64x32xf32>
    %cst_62 = arith.constant dense<0.000000e+00> : vector<128x32xf32>
    %113 = tpu.matmul %110, %112, %cst_62 {dimension_numbers = #tpu.dot_dimension_numbers<[1], [0], [0], [1], [0, 0, 1, 1], [], []>} : vector<128x64xf32>, vector<64x32xf32>, vector<128x32xf32> -> vector<128x32xf32>
    %114 = arith.addf %109, %113 : vector<128x32xf32>
    %c0_63 = arith.constant 0 : index
    %c0_64 = arith.constant 0 : index
    %115 = vector.load %arg6[%c0_63, %c0_64] : memref<1x32xf32, #tpu.memory_space<vmem>>, vector<1x32xf32>
    %116 = vector.broadcast %115 : vector<1x32xf32> to vector<128x32xf32>
    %117 = arith.addf %114, %116 : vector<128x32xf32>
    %118 = tpu.iota {dimensions = array<i32: 0>} : vector<128x32xi32>
    %c3_i32_65 = arith.constant 3 : i32
    %119 = vector.broadcast %c3_i32_65 : i32 to vector<128x32xi32>
    %120 = arith.shrsi %118, %119 : vector<128x32xi32>
    %c7_i32_66 = arith.constant 7 : i32
    %121 = vector.broadcast %c7_i32_66 : i32 to vector<128x32xi32>
    %122 = arith.andi %120, %121 : vector<128x32xi32>
    %c4_i32_67 = arith.constant 4 : i32
    %123 = vector.broadcast %c4_i32_67 : i32 to vector<128x32xi32>
    %124 = arith.cmpi sle, %122, %123 : vector<128x32xi32>
    %c7_i32_68 = arith.constant 7 : i32
    %125 = vector.broadcast %c7_i32_68 : i32 to vector<128x32xi32>
    %126 = arith.andi %118, %125 : vector<128x32xi32>
    %c4_i32_69 = arith.constant 4 : i32
    %127 = vector.broadcast %c4_i32_69 : i32 to vector<128x32xi32>
    %128 = arith.cmpi sle, %126, %127 : vector<128x32xi32>
    %129 = arith.andi %124, %128 : vector<128x32xi1>
    %cst_70 = arith.constant 0.000000e+00 : f32
    %130 = vector.broadcast %cst_70 : f32 to vector<128x32xf32>
    %131 = arith.select %129, %117, %130 : vector<128x32xi1>, vector<128x32xf32>
    %cst_71 = arith.constant dense<0.000000e+00> : vector<32xf32>
    %132 = vector.multi_reduction <add>, %131, %cst_71 [0] : vector<128x32xf32> to vector<32xf32>
    %133 = vector.shape_cast %132 : vector<32xf32> to vector<1x32xf32>
    %cst_72 = arith.constant 2.000000e-02 : f32
    %134 = vector.broadcast %cst_72 : f32 to vector<1x32xf32>
    %135 = arith.mulf %133, %134 : vector<1x32xf32>
    %136 = vector.broadcast %135 : vector<1x32xf32> to vector<128x32xf32>
    %137 = arith.subf %117, %136 : vector<128x32xf32>
    %138 = arith.mulf %137, %137 : vector<128x32xf32>
    %cst_73 = arith.constant 0.000000e+00 : f32
    %139 = vector.broadcast %cst_73 : f32 to vector<128x32xf32>
    %140 = arith.select %129, %138, %139 : vector<128x32xi1>, vector<128x32xf32>
    %cst_74 = arith.constant dense<0.000000e+00> : vector<32xf32>
    %141 = vector.multi_reduction <add>, %140, %cst_74 [0] : vector<128x32xf32> to vector<32xf32>
    %142 = vector.shape_cast %141 : vector<32xf32> to vector<1x32xf32>
    %cst_75 = arith.constant 2.000000e-02 : f32
    %143 = vector.broadcast %cst_75 : f32 to vector<1x32xf32>
    %144 = arith.mulf %142, %143 : vector<1x32xf32>
    %cst_76 = arith.constant 9.99999974E-6 : f32
    %145 = vector.broadcast %cst_76 : f32 to vector<1x32xf32>
    %146 = arith.addf %144, %145 : vector<1x32xf32>
    %147 = math.rsqrt %146 : vector<1x32xf32>
    %c0_77 = arith.constant 0 : index
    %c0_78 = arith.constant 0 : index
    %148 = vector.load %arg7[%c0_77, %c0_78] : memref<1x32xf32, #tpu.memory_space<vmem>>, vector<1x32xf32>
    %149 = arith.mulf %147, %148 : vector<1x32xf32>
    %150 = vector.broadcast %149 : vector<1x32xf32> to vector<128x32xf32>
    %151 = arith.mulf %137, %150 : vector<128x32xf32>
    %c0_79 = arith.constant 0 : index
    %c0_80 = arith.constant 0 : index
    %152 = vector.load %arg8[%c0_79, %c0_80] : memref<1x32xf32, #tpu.memory_space<vmem>>, vector<1x32xf32>
    %153 = vector.broadcast %152 : vector<1x32xf32> to vector<128x32xf32>
    %154 = arith.addf %151, %153 : vector<128x32xf32>
    %cst_81 = arith.constant 0.000000e+00 : f32
    %155 = vector.broadcast %cst_81 : f32 to vector<128x32xf32>
    %156 = arith.cmpf ogt, %154, %155 : vector<128x32xf32>
    %cst_82 = arith.constant 2.000000e-01 : f32
    %157 = vector.broadcast %cst_82 : f32 to vector<128x32xf32>
    %158 = arith.mulf %157, %154 : vector<128x32xf32>
    %159 = arith.select %156, %154, %158 : vector<128x32xi1>, vector<128x32xf32>
    %160 = vector.shape_cast %159 : vector<128x32xf32> to vector<2x64x32xf32>
    %c0_83 = arith.constant 0 : index
    %c0_84 = arith.constant 0 : index
    %161 = vector.load %arg9[%c0_83, %c0_84] : memref<64x32xf32, #tpu.memory_space<vmem>>, vector<64x32xf32>
    %162 = vector.shape_cast %161 : vector<64x32xf32> to vector<1x64x32xf32>
    %163 = vector.broadcast %162 : vector<1x64x32xf32> to vector<2x64x32xf32>
    %164 = arith.mulf %160, %163 : vector<2x64x32xf32>
    %cst_85 = arith.constant dense<0.000000e+00> : vector<2x64xf32>
    %165 = vector.multi_reduction <add>, %164, %cst_85 [2] : vector<2x64x32xf32> to vector<2x64xf32>
    %166 = vector.shape_cast %165 : vector<2x64xf32> to vector<2x64x1xf32>
    %cst_86 = arith.constant dense<0.000000e+00> : vector<2x1xf32>
    %167 = vector.multi_reduction <add>, %166, %cst_86 [1] : vector<2x64x1xf32> to vector<2x1xf32>
    %c0_87 = arith.constant 0 : index
    %c0_88 = arith.constant 0 : index
    %168 = vector.load %arg10[%c0_87, %c0_88] : memref<1x1xf32, #tpu.memory_space<vmem>>, vector<1x1xf32>
    %169 = vector.broadcast %168 : vector<1x1xf32> to vector<2x1xf32>
    %170 = arith.addf %167, %169 : vector<2x1xf32>
    %c0_89 = arith.constant 0 : index
    %c0_90 = arith.constant 0 : index
    %171 = vector.load %arg11[%c0_89, %c0_90] : memref<2x1xf32, #tpu.memory_space<vmem>>, vector<2x1xf32>
    tpu.vector_store %arg11[%c0_89, %c0_90], %170 {strides = array<i32>} : memref<2x1xf32, #tpu.memory_space<vmem>>, vector<2x1xf32>,
    return
  }
}

</mosaic_0001>

<bundles_post_ra>
// kernel: discriminator_forward.1
= control target key start
LH: loop header
LB: loop body
LE: loop exit
PB: predicated region body
PF: predicated region fallthrough
CT: control target
= control target key end

     0   :  { %vm5427_vm0 = vcmask 130048   ;;  %v943_v42 = vlaneseq  ;;  %vm5434_vm9 = vcmask 523264   ;;  %s3380_s23 = smov 112   ;;  %s3381_s24 = smov 96   ;;  %s5374_s1 = inlined_call_operand.vmem [shape: f32[4,16,64], index: 1, kind: input, shape index: {}]   ;;  %s5375_s0 = inlined_call_operand.vmem [shape: f32[144,16], index: 0, kind: input, shape index: {}]   ;;  %s5376_s2 = inlined_call_operand.vmem [shape: f32[1,64], index: 2, kind: input, shape index: {}]   ;;  %s5377_s5 = inlined_call_operand.vmem [shape: f32[4,64,32], index: 5, kind: input, shape index: {}]   ;;  %s5378_s3 = inlined_call_operand.vmem [shape: f32[1,64], index: 3, kind: input, shape index: {}]   ;;  %s5379_s4 = inlined_call_operand.vmem [shape: f32[1,64], index: 4, kind: input, shape index: {}]   ;;  %s5380_s6 = inlined_call_operand.vmem [shape: f32[1,32], index: 6, kind: input, shape index: {}]   ;;  %s5381_s7 = inlined_call_operand.vmem [shape: f32[1,32], index: 7, kind: input, shape index: {}]   ;;  %s5382_s8 = inlined_call_operand.vmem [shape: f32[1,32], index: 8, kind: input, shape index: {}]   ;;  %s5383_s9 = inlined_call_operand.vmem [shape: f32[64,32], index: 9, kind: input, shape index: {}]   ;;  %s5384_s10 = inlined_call_operand.<no memory space> [shape: f32[1,1], index: 10, kind: input, shape index: {}]   ;;  %s5385_s11 = inlined_call_operand.vmem [shape: f32[2,1], index: 11, kind: output, shape index: {}]  }
   0x1   :  { %v2766_v0 = vld [vmem:[%s5374_s1 + $0x18] sm:$0xff]  ;;  %v57_v1 = vld [vmem:[%s5374_s1 + $0x8] sm:$0xff]  ;;  %v2765_v2 = vld [vmem:[%s5374_s1 + $0x10] sm:$0xff]  ;;  %s3382_s25 = smov 32   ;;  %s3383_s26 = smov 16  }
   0x2   :  { %3096 = vmatprep.subr.mxu0 %v2766_v0  ;;  %3124 = vmatprep.subr.mxu1 %v57_v1  ;;  %v56_v3 = vld [vmem:[%s5374_s1] sm:$0xff]  ;;  %v3467_v6 = vld [vmem:[%s5375_s0 + $0x9] sm:$0xff]  ;;  %v2818_v9 = vld [vmem:[%s5374_s1 + $0x38] sm:$0xff]  ;;  %v3668_v43 = vshrl.u32 %v943_v42, 7  ;;  %v961_v53 = vand.u32 127, %v943_v42  ;;  %s3384_s27 = smov 48  }
   0x3   :  { %v58_v4 = vld [vmem:[%s5375_s0 + $0x1] sm:$0xff]  ;;  %3097 = vmatpush3.msra.mxu0 %v2766_v0  ;;  %3125 = vmatpush3.msra.mxu1 %v57_v1  ;;  %v3485_v10 = vld [vmem:[%s5375_s0 + $0x11] sm:$0xff]  ;;  %v3499_v12 = vld [vmem:[%s5375_s0 + $0x19] sm:$0xff] }
   0x4   :  { %v40_v5 = vld [vmem:[%s5375_s0] sm:$0xff]  ;;  %3098 = vmatprep.subr.mxu0 %v2765_v2  ;;  %3126 = vmatprep.subr.mxu1 %v56_v3  ;;  %v3472_v7 = vld [vmem:[%s5375_s0 + $0x8] sm:$0xff]  ;;  %v3494_v11 = vld [vmem:[%s5375_s0 + $0x10] sm:$0xff]  ;;  %v3671_v44 = vadd.s32 8, %v3668_v43  ;;  %v3683_v50 = vadd.s32 24, %v3668_v43  ;;  %v962_v54 = vshra.s32 %v3668_v43, 3 }
   0x5   :  { %3099 = vmatpush3.msra.mxu0 %v2765_v2  ;;  %3100 = vmatprep.mubr.msk.f32.mxu0 %vm5427_vm0, %v58_v4  ;;  %v2800_v8 = vld [vmem:[%s5374_s1 + $0x28] sm:$0xff]  ;;  %v3504_v13 = vld [vmem:[%s5375_s0 + $0x18] sm:$0xff]  ;;  %v3516_v15 = vld [vmem:[%s5375_s0 + $0x20] sm:$0xff]  ;;  %v3695_v57 = vadd.s32 16, %v3668_v43  ;;  %v3698_v58 = vadd.s32 40, %v3668_v43  ;;  %v1059_v0 = vshra.s32 %v961_v53, 4 }
   0x6   :  { %3127 = vmatpush3.msra.mxu1 %v56_v3  ;;  %3128 = vmatprep.mubr.msk.f32.mxu1 %vm5427_vm0, %v40_v5  ;;  %v3511_v14 = vld [vmem:[%s5375_s0 + $0x21] sm:$0xff]  ;;  %v2817_v17 = vld [vmem:[%s5374_s1 + $0x30] sm:$0xff]  ;;  %v65_v22 = vld [vmem:[%s5375_s0 + $0x39] sm:$0xff]  ;;  %5445 = vst [vmem:[#allocation4_spill] sm:$0xff] %v3671_v44  ;;  %v963_v49 = vshra.s32 %v3671_v44, 3  ;;  %v965_v60 = vshra.s32 %v3683_v50, 3 }
   0x7   :  { %3101 = vmatmul.mubr.msk.f32.vlgmr.msra.gmra.mxu0 %vm5427_vm0, %v3467_v6  ;;  %3129 = vmatmul.mubr.msk.f32.vlgmr.msra.gmra.mxu1 %vm5427_vm0, %v3472_v7  ;;  %v2799_v16 = vld [vmem:[%s5374_s1 + $0x20] sm:$0xff]  ;;  %v63_v18 = vld [vmem:[%s5375_s0 + $0x29] sm:$0xff]  ;;  %v64_v20 = vld [vmem:[%s5375_s0 + $0x31] sm:$0xff]  ;;  %5446 = vst [vmem:[#allocation5_spill] sm:$0xff] %v3683_v50  ;;  %v5390_v63 = vand.u32 7, %v3671_v44  ;;  %v3708_v1 = vand.u32 7, %v962_v54 }
   0x8   :  { %3152 = vmatprep.subr.mxu0 %v2800_v8  ;;  %3180 = vmatprep.subr.mxu1 %v2818_v9  ;;  %v45_v19 = vld [vmem:[%s5375_s0 + $0x28] sm:$0xff]  ;;  %v46_v21 = vld [vmem:[%s5375_s0 + $0x30] sm:$0xff]  ;;  %v47_v23 = vld [vmem:[%s5375_s0 + $0x38] sm:$0xff]  ;;  %5447 = vst [vmem:[#allocation6_spill] sm:$0xff] %v3695_v57  ;;  %v3700_v59 = vand.u32 7, %v963_v49  ;;  %v5389_v4 = vand.u32 7, %v3668_v43 }
   0x9   :  { %3153 = vmatpush3.msra.mxu0 %v2800_v8  ;;  %3103 = vmatprep.mubr.msk.f32.mxu0 %vm5427_vm0, %v3485_v10  ;;  %v66_v24 = vld [vmem:[%s5375_s0 + $0x41] sm:$0xff]  ;;  %v67_v26 = vld [vmem:[%s5375_s0 + $0x49] sm:$0xff]  ;;  %v68_v28 = vld [vmem:[%s5375_s0 + $0x51] sm:$0xff]  ;;  %5448 = vst [vmem:[#allocation7_spill] sm:$0xff] %v3698_v58  ;;  %v964_v5 = vshra.s32 %v3695_v57, 3  ;;  %v3718_v8 = vshra.s32 %v961_v53, 5 }
   0xa   :  { %3131 = vmatprep.mubr.msk.f32.mxu1 %vm5427_vm0, %v3494_v11  ;;  %3181 = vmatpush3.msra.mxu1 %v2818_v9  ;;  %v48_v25 = vld [vmem:[%s5375_s0 + $0x40] sm:$0xff]  ;;  %v49_v27 = vld [vmem:[%s5375_s0 + $0x48] sm:$0xff]  ;;  %v50_v29 = vld [vmem:[%s5375_s0 + $0x50] sm:$0xff]  ;;  %5449 = vst [vmem:[#allocation8_spill] sm:$0xff] %v3700_v59  ;;  %v3720_v9 = vand.u32 7, %v965_v60 }
   0xb   :  { %3104 = vmatmul.mubr.msk.f32.gmra.mxu0 %vm5427_vm0, %v3499_v12  ;;  %3132 = vmatmul.mubr.msk.f32.gmra.mxu1 %vm5427_vm0, %v3504_v13  ;;  %v69_v30 = vld [vmem:[%s5375_s0 + $0x59] sm:$0xff]  ;;  %v70_v32 = vld [vmem:[%s5375_s0 + $0x61] sm:$0xff]  ;;  %v71_v34 = vld [vmem:[%s5375_s0 + $0x69] sm:$0xff]  ;;  %5450 = vst [vmem:[#allocation9_spill] sm:$0xff] %v3708_v1 }
   0xc   :  { %3106 = vmatprep.mubr.msk.f32.mxu0 %vm5427_vm0, %v3511_v14  ;;  %3134 = vmatprep.mubr.msk.f32.mxu1 %vm5427_vm0, %v3516_v15  ;;  %v51_v31 = vld [vmem:[%s5375_s0 + $0x58] sm:$0xff]  ;;  %v52_v33 = vld [vmem:[%s5375_s0 + $0x60] sm:$0xff]  ;;  %v53_v35 = vld [vmem:[%s5375_s0 + $0x68] sm:$0xff]  ;;  %5451 = vst [vmem:[#allocation10_spill] sm:$0xff] %v3720_v9 }
   0xd   :  { %3154 = vmatprep.subr.mxu0 %v2799_v16  ;;  %3182 = vmatprep.subr.mxu1 %v2817_v17  ;;  %v72_v36 = vld [vmem:[%s5375_s0 + $0x71] sm:$0xff]  ;;  %v73_v38 = vld [vmem:[%s5375_s0 + $0x79] sm:$0xff]  ;;  %v707_v41 = vld [vmem:[%s5375_s0 + $0x81] sm:$0xff] }
   0xe   :  { %3155 = vmatpush3.msra.mxu0 %v2799_v16  ;;  %3183 = vmatpush3.msra.mxu1 %v2817_v17  ;;  %v54_v37 = vld [vmem:[%s5375_s0 + $0x70] sm:$0xff]  ;;  %v55_v39 = vld [vmem:[%s5375_s0 + $0x78] sm:$0xff]  ;;  %v479_v40 = vld [vmem:[%s5375_s0 + $0x80] sm:$0xff]  ;;  %v3733_v16 = vadd.s32 32, %v3668_v43  ;;  %v5387_v17 = vand.u32 7, %v3695_v57 }
   0xf   :  { %3107 = vmatmul.mubr.msk.f32.gmra.mxu0 %vm5427_vm0, %v63_v18  ;;  %3135 = vmatmul.mubr.msk.f32.gmra.mxu1 %vm5427_vm0, %v45_v19 }
  0x10   :  { %3109 = vmatprep.mubr.msk.f32.mxu0 %vm5427_vm0, %v64_v20  ;;  %3137 = vmatprep.mubr.msk.f32.mxu1 %vm5427_vm0, %v46_v21  ;;  %5452 = vst [vmem:[#allocation11_spill] sm:$0xff] %v3733_v16  ;;  %v5398_v53 = vand.u32 7, %v3733_v16 }
  0x13   :  { %3110 = vmatmul.mubr.msk.f32.gmra.mxu0 %vm5427_vm0, %v65_v22  ;;  %3138 = vmatmul.mubr.msk.f32.gmra.mxu1 %vm5427_vm0, %v47_v23 }
  0x14   :  { %3112 = vmatprep.mubr.msk.f32.mxu0 %vm5427_vm0, %v66_v24  ;;  %3140 = vmatprep.mubr.msk.f32.mxu1 %vm5427_vm0, %v48_v25 }
  0x17   :  { %3113 = vmatmul.mubr.msk.f32.gmra.mxu0 %vm5427_vm0, %v67_v26  ;;  %3141 = vmatmul.mubr.msk.f32.gmra.mxu1 %vm5427_vm0, %v49_v27 }
  0x18   :  { %3115 = vmatprep.mubr.msk.f32.mxu0 %vm5427_vm0, %v68_v28  ;;  %3143 = vmatprep.mubr.msk.f32.mxu1 %vm5427_vm0, %v50_v29 }
  0x1b   :  { %3116 = vmatmul.mubr.msk.f32.gmra.mxu0 %vm5427_vm0, %v69_v30  ;;  %3144 = vmatmul.mubr.msk.f32.gmra.mxu1 %vm5427_vm0, %v51_v31 }
  0x1c   :  { %3118 = vmatprep.mubr.msk.f32.mxu0 %vm5427_vm0, %v70_v32  ;;  %3146 = vmatprep.mubr.msk.f32.mxu1 %vm5427_vm0, %v52_v33 }
  0x1f   :  { %3119 = vmatmul.mubr.msk.f32.gmra.mxu0 %vm5427_vm0, %v71_v34  ;;  %3147 = vmatmul.mubr.msk.f32.gmra.mxu1 %vm5427_vm0, %v53_v35 }
  0x20   :  { %3121 = vmatprep.mubr.msk.f32.mxu0 %vm5427_vm0, %v72_v36  ;;  %3149 = vmatprep.mubr.msk.f32.mxu1 %vm5427_vm0, %v54_v37 }
  0x23   :  { %3122 = vmatmul.mubr.msk.f32.gmra.mxu0 %vm5427_vm0, %v73_v38  ;;  %3150 = vmatmul.mubr.msk.f32.gmra.mxu1 %vm5427_vm0, %v55_v39 }
  0x24   :  { %3156 = vmatprep.mubr.msk.f32.mxu0 %vm5427_vm0, %v3472_v7  ;;  %3184 = vmatprep.mubr.msk.f32.mxu1 %vm5427_vm0, %v3467_v6  ;;  %v967_v6 = vshra.s32 %v3698_v58, 3  ;;  %v995_v7 = vmul.u32 2, %v3700_v59 }
  0x27   :  { %3157 = vmatmul.mubr.msk.f32.vlgmr.msra.gmra.mxu0 %vm5427_vm0, %v3494_v11  ;;  %3185 = vmatmul.mubr.msk.f32.vlgmr.msra.gmra.mxu1 %vm5427_vm0, %v3485_v10  ;;  %v5388_v10 = vand.u32 7, %v3683_v50 }
  0x28   :  { %3159 = vmatprep.mubr.msk.f32.mxu0 %vm5427_vm0, %v3504_v13  ;;  %3187 = vmatprep.mubr.msk.f32.mxu1 %vm5427_vm0, %v3499_v12  ;;  %v1044_v13 = vmul.u32 2, %v5390_v63 }
  0x2b   :  { %3160 = vmatmul.mubr.msk.f32.gmra.mxu0 %vm5427_vm0, %v3516_v15  ;;  %3188 = vmatmul.mubr.msk.f32.gmra.mxu1 %vm5427_vm0, %v3511_v14  ;;  %v3729_v14 = vand.u32 1, %v1059_v0  ;;  %v994_v15 = vmul.u32 2, %v3708_v1 }
  0x2c   :  { %3162 = vmatprep.mubr.msk.f32.mxu0 %vm5427_vm0, %v45_v19  ;;  %3190 = vmatprep.mubr.msk.f32.mxu1 %vm5427_vm0, %v63_v18  ;;  %v3737_v18 = vadd.s32 56, %v3668_v43  ;;  %v3740_v19 = vadd.s32 48, %v3668_v43 }
  0x2e   :  { %5453 = vst [vmem:[#allocation12_spill] sm:$0xff] %v3737_v18  ;;  %5454 = vst [vmem:[#allocation13_spill] sm:$0xff] %v3740_v19 }
  0x2f   :  { %3163 = vmatmul.mubr.msk.f32.gmra.mxu0 %vm5427_vm0, %v46_v21  ;;  %3191 = vmatmul.mubr.msk.f32.gmra.mxu1 %vm5427_vm0, %v64_v20 }
  0x30   :  { %3165 = vmatprep.mubr.msk.f32.mxu0 %vm5427_vm0, %v47_v23  ;;  %3193 = vmatprep.mubr.msk.f32.mxu1 %vm5427_vm0, %v65_v22  ;;  %v1043_v22 = vmul.u32 2, %v5389_v4  ;;  %v3748_v23 = vand.u32 7, %v964_v5 }
  0x32   :  { %5455 = vst [vmem:[#allocation14_spill] sm:$0xff] %v3748_v23  ;;  %v996_v42 = vmul.u32 2, %v3748_v23 }
  0x33   :  { %3166 = vmatmul.mubr.msk.f32.gmra.mxu0 %vm5427_vm0, %v48_v25  ;;  %3194 = vmatmul.mubr.msk.f32.gmra.mxu1 %vm5427_vm0, %v66_v24  ;;  %v3750_v24 = vand.u32 7, %v967_v6  ;;  %v3753_v25 = vadd.s32 %v3718_v8, %v995_v7 }
  0x34   :  { %3168 = vmatprep.mubr.msk.f32.mxu0 %vm5427_vm0, %v49_v27  ;;  %3196 = vmatprep.mubr.msk.f32.mxu1 %vm5427_vm0, %v67_v26  ;;  %v997_v26 = vmul.u32 2, %v3720_v9  ;;  %v1046_v27 = vmul.u32 2, %v5388_v10  ;;  %v3825_v63 = vadd.s32 %v3718_v8, %v996_v42 }
  0x35   :  { %5456 = vst [vmem:[#allocation15_spill] sm:$0xff] %v3750_v24  ;;  %v999_v49 = vmul.u32 2, %v3750_v24  ;;  %vm1078_vm1 = vcmp.le.s32.totalorder %v3753_v25, 12 }
  0x36   :  { %v3791_v54 = vadd.s32 %v3718_v8, %v997_v26  ;;  %v3794_v60 = vadd.s32 %v3729_v14, %v1046_v27  ;;  %v3810_v26 = vadd.s32 80, %v3668_v43  ;;  %vm1079_vm7 = vcmp.le.s32.totalorder %v3825_v63, 12 }
  0x37   :  { %3169 = vmatmul.mubr.msk.f32.gmra.mxu0 %vm5427_vm0, %v50_v29  ;;  %3197 = vmatmul.mubr.msk.f32.gmra.mxu1 %vm5427_vm0, %v68_v28  ;;  %v5386_v28 = vand.u32 7, %v3698_v58  ;;  %v3828_v5 = vadd.s32 %v3718_v8, %v999_v49  ;;  %v5467_v58 = vand.u32 7, %v3737_v18 }
  0x38   :  { %3171 = vmatprep.mubr.msk.f32.mxu0 %vm5427_vm0, %v51_v31  ;;  %3199 = vmatprep.mubr.msk.f32.mxu1 %vm5427_vm0, %v69_v30  ;;  %v3764_v31 = vadd.s32 %v3729_v14, %v1044_v13  ;;  %5462 = vst [vmem:[#allocation21_spill] sm:$0xff] %v3810_v26  ;;  %vm1080_vm5 = vcmp.le.s32.totalorder %v3791_v54, 12  ;;  %vm1096_vm6 = vcmp.le.s32.totalorder %v3794_v60, 12 }
  0x39   :  { %v1048_v0 = vmul.u32 2, %v5386_v28  ;;  %v1050_v24 = vmul.u32 2, %v5467_v58  ;;  %vm1082_vm10 = vcmp.le.s32.totalorder %v3828_v5, 12 }
  0x3a   :  { %vm1094_vm2 = vcmp.le.s32.totalorder %v3764_v31, 12 }
  0x3b   :  { %3172 = vmatmul.mubr.msk.f32.gmra.mxu0 %vm5427_vm0, %v52_v33  ;;  %3200 = vmatmul.mubr.msk.f32.gmra.mxu1 %vm5427_vm0, %v70_v32  ;;  %v3767_v32 = vadd.s32 %v3718_v8, %v994_v15  ;;  %v966_v33 = vshra.s32 %v3733_v16, 3  ;;  %v3873_v42 = vadd.s32 %v3729_v14, %v1050_v24  ;;  %vm3981_vm14 = vmand %vm1078_vm1, %vm1094_vm2 }
  0x3c   :  { %3174 = vmatprep.mubr.msk.f32.mxu0 %vm5427_vm0, %v53_v35  ;;  %3202 = vmatprep.mubr.msk.f32.mxu1 %vm5427_vm0, %v71_v34  ;;  %v3771_v34 = vadd.s32 72, %v3668_v43  ;;  %v1045_v35 = vmul.u32 2, %v5387_v17 }
  0x3d   :  { %v3803_v13 = vand.u32 7, %v966_v33  ;;  %vm1077_vm3 = vcmp.le.s32.totalorder %v3767_v32, 12  ;;  %vm1100_vm12 = vcmp.le.s32.totalorder %v3873_v42, 12  ;;  %v4003_v32 = vadd.s32 112, %v3668_v43 }
  0x3e   :  { %5457 = vst [vmem:[#allocation16_spill] sm:$0xff] %v3771_v34  ;;  %v971_v15 = vshra.s32 %v3771_v34, 3  ;;  %v3813_v27 = vadd.s32 %v3729_v14, %v1045_v35  ;;  %v1047_v35 = vmul.u32 2, %v5398_v53 }
  0x3f   :  { %3175 = vmatmul.mubr.msk.f32.gmra.mxu0 %vm5427_vm0, %v54_v37  ;;  %3203 = vmatmul.mubr.msk.f32.gmra.mxu1 %vm5427_vm0, %v72_v36  ;;  %v969_v36 = vshra.s32 %v3737_v18, 3  ;;  %v968_v37 = vshra.s32 %v3740_v19, 3  ;;  %5460 = vst [vmem:[#allocation19_spill] sm:$0xff] %v3803_v13  ;;  %v998_v16 = vmul.u32 2, %v3803_v13  ;;  %v5429_v63 = vand.u32 7, %v4003_v32 }
  0x40   :  { %3177 = vmatprep.mubr.msk.f32.mxu0 %vm5427_vm0, %v55_v39  ;;  %3205 = vmatprep.mubr.msk.f32.mxu1 %vm5427_vm0, %v73_v38  ;;  %v3778_v38 = vadd.s32 64, %v3668_v43  ;;  %v3847_v53 = vand.u32 7, %v971_v15  ;;  %v3863_v15 = vadd.s32 %v3729_v14, %v1047_v35  ;;  %v5476_v35 = vand.u32 7, %v3771_v34 }
  0x41   :  { %v3815_v28 = vand.u32 7, %v969_v36  ;;  %v3817_v17 = vand.u32 7, %v968_v37  ;;  %v3833_v36 = vadd.s32 104, %v3668_v43  ;;  %v3836_v37 = vadd.s32 %v3729_v14, %v1048_v0 }
  0x42   :  { %5458 = vst [vmem:[#allocation17_spill] sm:$0xff] %v3778_v38  ;;  %v970_v10 = vshra.s32 %v3778_v38, 3  ;;  %5470 = vst [vmem:[#allocation28_spill] sm:$0xff] %v3847_v53  ;;  %v972_v0 = vshra.s32 %v3810_v26, 3  ;;  %v1052_v59 = vmul.u32 2, %v5476_v35  ;;  %v5481_v34 = vand.u32 7, %v3778_v38 }
  0x43   :  { %3178 = vmatmul.mubr.msk.f32.gmra.mxu0 %vm5427_vm0, %v479_v40  ;;  %3206 = vmatmul.mubr.msk.f32.gmra.mxu1 %vm5427_vm0, %v707_v41  ;;  %v3785_v41 = vadd.s32 %v3729_v14, %v1043_v22  ;;  %v3807_v22 = vadd.s32 88, %v3668_v43  ;;  %5463 = vst [vmem:[#allocation22_spill] sm:$0xff] %v3815_v28  ;;  %5464 = vst [vmem:[#allocation23_spill] sm:$0xff] %v3817_v17  ;;  %v1001_v9 = vmul.u32 2, %v3815_v28  ;;  %v1000_v58 = vmul.u32 2, %v3817_v17 }
  0x44   :  { %v3853_v18 = vand.u32 7, %v970_v10  ;;  %v975_v28 = vshra.s32 %v3833_v36, 3  ;;  %v3868_v10 = vadd.s32 96, %v3668_v43  ;;  %v5475_v17 = vand.u32 7, %v3740_v19 }
  0x45   :  { %5461 = vst [vmem:[#allocation20_spill] sm:$0xff] %v3807_v22  ;;  %v973_v50 = vshra.s32 %v3807_v22, 3  ;;  %vm1093_vm4 = vcmp.le.s32.totalorder %v3785_v41, 12  ;;  %v3890_v24 = vand.u32 7, %v972_v0  ;;  %v3896_v35 = vadd.s32 %v3718_v8, %v1000_v58 }
  0x46   :  { %5471 = vst [vmem:[#allocation29_spill] sm:$0xff] %v3853_v18  ;;  %5474 = vst [vmem:[#allocation32_spill] sm:$0xff] %v3868_v10  ;;  %v1049_v44 = vmul.u32 2, %v5475_v17  ;;  %v3893_v17 = vadd.s32 %v3718_v8, %v1001_v9  ;;  %v1002_v13 = vmul.u32 2, %v3853_v18  ;;  %v3909_v0 = vand.u32 7, %v975_v28 }
  0x47   :  { %5480 = vst [vmem:[#allocation36_spill] sm:$0xff] %v3890_v24  ;;  %v1051_v19 = vmul.u32 2, %v5481_v34  ;;  %v974_v18 = vshra.s32 %v3868_v10, 3  ;;  %vm1095_vm8 = vcmp.le.s32.totalorder %v3813_v27, 12  ;;  %v5485_v28 = vand.u32 7, %v3810_v26  ;;  %vm3989_vm15 = vmand %vm1077_vm3, %vm1093_vm4 }
  0x48   :  { %v3918_v38 = vadd.s32 %v3729_v14, %v1049_v44  ;;  %vm1098_vm11 = vcmp.le.s32.totalorder %v3836_v37, 12  ;;  %vm1097_vm13 = vcmp.le.s32.totalorder %v3863_v15, 12  ;;  %vm1084_vm0 = vcmp.le.s32.totalorder %v3893_v17, 12  ;;  %vm4030_vm3 = vmand %vm1080_vm5, %vm1096_vm6 }
  0x49   :  { %vm1083_vm1 = vcmp.le.s32.totalorder %v3896_v35, 12  ;;  %vm4041_vm4 = vmand %vm1079_vm7, %vm1095_vm8 }
  0x4a   :  { %vm1099_vm2 = vcmp.le.s32.totalorder %v3918_v38, 12  ;;  %vm4078_vm7 = vmand %vm1082_vm10, %vm1098_vm11 }
  0xc7   :  { %v3673_v45 = vpop.f32.mrf.mxu0  ;;  %v3675_v46 = vpop.f32.mrf.mxu1 }
  0xc8   :  { %v391_v34 = vadd.f32 %v3675_v46, %v3673_v45  ;;  %v1004_v46 = vmul.u32 2, %v3890_v24 }
  0xc9   :  { %v3677_v47 = vpop.f32.mrf.mxu0  ;;  %v3679_v48 = vpop.f32.mrf.mxu1 }
  0xca   :  { %v386_v44 = vadd.f32 %v3679_v48, %v3677_v47  ;;  %v1007_v47 = vmul.u32 2, %v3909_v0  ;;  %v5486_v48 = vand.u32 7, %v3833_v36 }
  0xcb   :  { %v3685_v51 = vpop.f32.mrf.mxu0  ;;  %v3687_v52 = vpop.f32.mrf.mxu1 }
  0xcc   :  { %v3996_v25 = vadd.s32 %v3718_v8, %v1007_v47 }
  0xcd   :  { %v3690_v55 = vpop.f32.mrf.mxu0  ;;  %v3692_v56 = vpop.f32.mrf.mxu1 }
  0xcf   :  { %v3703_v61 = vpop.f32.mrf.mxu0  ;;  %v3705_v62 = vpop.f32.mrf.mxu1 }
  0xd1   :  { %v3710_v2 = vpop.f32.mrf.mxu0  ;;  %v3712_v3 = vpop.f32.mrf.mxu1 }
  0xd3   :  { %v3723_v11 = vpop.f32.mrf.mxu0  ;;  %v3725_v12 = vpop.f32.mrf.mxu1 }
  0xd5   :  { %v3742_v20 = vpop.f32.mrf.mxu0  ;;  %v3744_v21 = vpop.f32.mrf.mxu1 }
  0xd7   :  { %v3759_v29 = vpop.f32.mrf.mxu0  ;;  %v3761_v30 = vpop.f32.mrf.mxu1 }
  0xd9   :  { %v3780_v39 = vpop.f32.mrf.mxu0  ;;  %v3782_v40 = vpop.f32.mrf.mxu1 }
  0xdb   :  { %v3799_v6 = vpop.f32.mrf.mxu0  ;;  %v3801_v7 = vpop.f32.mrf.mxu1 }
  0xdc   :  { %5459 = vst [vmem:[#allocation18_spill] sm:$0xff] %v3801_v7 }
  0xdd   :  { %v3820_v4 = vpop.f32.mrf.mxu0  ;;  %v3822_v33 = vpop.f32.mrf.mxu1 }
  0xde   :  { %5465 = vst [vmem:[#allocation24_spill] sm:$0xff] %v3820_v4  ;;  %5466 = vst [vmem:[#allocation25_spill] sm:$0xff] %v3822_v33  ;;  %v3888_v33 = vand.u32 7, %v973_v50  ;;  %v5484_v50 = vand.u32 7, %v3807_v22 }
  0xdf   :  { %v3842_v23 = vpop.f32.mrf.mxu0  ;;  %v3844_v49 = vpop.f32.mrf.mxu1 }
  0xe0   :  { %5468 = vst [vmem:[#allocation26_spill] sm:$0xff] %v3842_v23  ;;  %5469 = vst [vmem:[#allocation27_spill] sm:$0xff] %v3844_v49  ;;  %v3885_v49 = vadd.s32 %v3718_v8, %v998_v16  ;;  %v1003_v23 = vmul.u32 2, %v3847_v53  ;;  %v1054_v9 = vmul.u32 2, %v5484_v50  ;;  %v3921_v53 = vadd.s32 %v3729_v14, %v1052_v59 }
  0xe1   :  { %v3856_v57 = vpop.f32.mrf.mxu0  ;;  %v3858_v1 = vpop.f32.mrf.mxu1  ;;  %5479 = vst [vmem:[#allocation35_spill] sm:$0xff] %v3888_v33  ;;  %v1053_v50 = vmul.u32 2, %v5485_v28  ;;  %v1005_v45 = vmul.u32 2, %v3888_v33  ;;  %v3934_v59 = vadd.s32 %v3718_v8, %v1002_v13  ;;  %v3937_v28 = vadd.s32 %v3729_v14, %v1051_v19 }
  0xe2   :  { %5472 = vst [vmem:[#allocation30_spill] sm:$0xff] %v3856_v57  ;;  %5473 = vst [vmem:[#allocation31_spill] sm:$0xff] %v3858_v1  ;;  %v3950_v13 = vand.u32 7, %v974_v18  ;;  %v401_v19 = vadd.f32 %v3687_v52, %v3685_v51  ;;  %v3965_v51 = vadd.s32 %v3718_v8, %v1004_v46  ;;  %v5487_v52 = vand.u32 7, %v3868_v10 }
  0xe3   :  { %v3880_v1 = vpop.f32.mrf.mxu0  ;;  %v3882_v57 = vpop.f32.mrf.mxu1  ;;  %v3957_v4 = vadd.s32 %v3729_v14, %v1053_v50  ;;  %v3962_v18 = vadd.s32 %v3718_v8, %v1005_v45  ;;  %vm1102_vm6 = vcmp.le.s32.totalorder %v3921_v53, 12  ;;  %vm5500_vm10 = vcmp.le.s32.totalorder %v3885_v49, 12 }
  0xe4   :  { %5477 = vst [vmem:[#allocation33_spill] sm:$0xff] %v3880_v1  ;;  %5478 = vst [vmem:[#allocation34_spill] sm:$0xff] %v3882_v57  ;;  %v1006_v41 = vmul.u32 2, %v3950_v13  ;;  %v1057_v49 = vmul.u32 2, %v5429_v63 }
  0xe5   :  { %v3901_v57 = vpop.f32.mrf.mxu0  ;;  %v3903_v16 = vpop.f32.mrf.mxu1  ;;  %vm4092_vm11 = vmand %vm5500_vm10, %vm1097_vm13  ;;  %vm1103_vm5 = vcmp.le.s32.totalorder %v3957_v4, 12  ;;  %v5508_v38 = vld [vmem:[#allocation24_spill] sm:$0xff]  ;;  %v5509_v35 = vld [vmem:[#allocation25_spill] sm:$0xff] }
  0xe6   :  { %5482 = vst [vmem:[#allocation37_spill] sm:$0xff] %v3901_v57  ;;  %5483 = vst [vmem:[#allocation38_spill] sm:$0xff] %v3903_v16  ;;  %v3926_v16 = vadd.s32 %v3718_v8, %v1003_v23  ;;  %v3942_v23 = vld [vmem:[%s5376_s2] ss:$0 sm:$0xff]  ;;  %v3945_v57 = vadd.s32 %v3729_v14, %v1054_v9  ;;  %v4046_v10 = vadd.s32 %v3718_v8, %v1006_v41  ;;  %s3379_s2 = smov 80  }
  0xe7   :  { %v3158_v22 = vpop.f32.mrf.mxu0  ;;  %v3186_v58 = vpop.f32.mrf.mxu1  ;;  %vm4113_vm13 = vmand %vm1084_vm0, %vm1100_vm12  ;;  %v5514_v63 = vld [vmem:[#allocation27_spill] sm:$0xff]  ;;  %vm5515_vm12 = vcmp.le.s32.totalorder %v3937_v28, 12  ;;  %v1075_v28 = vadd.s32 %v3729_v14, %v1057_v49 }
  0xe8   :  { %v677_v1 = vadd.f32 %v3158_v22, %v391_v34  ;;  %v1056_v22 = vmul.u32 2, %v5486_v48  ;;  %vm4129_vm0 = vmand %vm1083_vm1, %vm1099_vm2  ;;  %vm5510_vm2 = vcmp.le.s32.totalorder %v3926_v16, 12  ;;  %vm5516_vm1 = vcmp.le.s32.totalorder %v3934_v59, 12 }
  0xe9   :  { %v597_v26 = vpop.f32.mrf.mxu0  ;;  %v825_v24 = vpop.f32.mrf.mxu1  ;;  %vm4162_vm10 = vmand %vm5510_vm2, %vm1102_vm6  ;;  %vm5519_vm6 = vcmp.le.s32.totalorder %v3945_v57, 12  ;;  %vm5525_vm2 = vcmp.le.s32.totalorder %v3965_v51, 12 }
  0xea   :  { %v905_v34 = vadd.f32 %v3186_v58, %v677_v1  ;;  %v676_v33 = vadd.f32 %v597_v26, %v386_v44  ;;  %v1055_v1 = vmul.u32 2, %v5487_v52  ;;  %v3970_v26 = vadd.s32 120, %v3668_v43  ;;  %vm4172_vm8 = vmand %vm5516_vm1, %vm5515_vm12 }
  0xeb   :  { %v3161_v9 = vpop.f32.mrf.mxu0  ;;  %v3189_v7 = vpop.f32.mrf.mxu1  ;;  %v396_v58 = vadd.f32 %v3692_v56, %v3690_v55  ;;  %v3999_v31 = vadd.s32 %v3729_v14, %v1056_v22  ;;  %vm5520_vm12 = vcmp.le.s32.totalorder %v3962_v18, 12  ;;  %v5526_v18 = vmov 0 }
  0xec   :  { %5488 = vst [vmem:[#allocation39_spill] sm:$0xff] %v3970_v26  ;;  %v3975_v50 = vadd.f32 %v3942_v23, %v905_v34  ;;  %v904_v46 = vadd.f32 %v825_v24, %v676_v33  ;;  %v679_v44 = vadd.f32 %v3161_v9, %v401_v19  ;;  %v411_v33 = vadd.f32 %v3705_v62, %v3703_v61  ;;  %vm4190_vm1 = vmand %vm5520_vm12, %vm5519_vm6 }
  0xed   :  { %v607_v55 = vpop.f32.mrf.mxu0  ;;  %v835_v56 = vpop.f32.mrf.mxu1  ;;  %v4016_v52 = vadd.s32 %v3729_v14, %v1055_v1  ;;  %v977_v61 = vshra.s32 %v3970_v26, 3  ;;  %vm4206_vm6 = vmand %vm5525_vm2, %vm1103_vm5  ;;  %vm5532_vm5 = vcmp.le.s32.totalorder %v3999_v31, 12  ;;  %vm5533_vm12 = vcmp.le.s32.totalorder %v3996_v25, 12 }
  0xee   :  { %v4008_v24 = vadd.f32 %v3942_v23, %v904_v46  ;;  %v907_v19 = vadd.f32 %v3189_v7, %v679_v44  ;;  %v678_v34 = vadd.f32 %v607_v55, %v396_v58  ;;  %v1126_v47 = vsel %vm3981_vm14, %v3975_v50, 0.0  ;;  %vm4234_vm2 = vmand %vm5533_vm12, %vm5532_vm5 }
  0xef   :  { %v3164_v22 = vpop.f32.mrf.mxu0  ;;  %v3192_v9 = vpop.f32.mrf.mxu1  ;;  %v406_v55 = vadd.f32 %v3712_v3, %v3710_v2  ;;  %v421_v2 = vadd.f32 %v3725_v12, %v3723_v11  ;;  %v1143_v41 = vsel %vm5434_vm9, %v1126_v47, 0.0  ;;  %v4062_v11 = vand.u32 7, %v977_v61 }
  0xf0   :  { %v1125_v7 = vsel %vm3989_vm15, %v4008_v24, 0.0  ;;  %v4024_v58 = vadd.f32 %v3942_v23, %v907_v19  ;;  %v906_v1 = vadd.f32 %v835_v56, %v678_v34  ;;  %v681_v44 = vadd.f32 %v3164_v22, %v411_v33 }
  0xf1   :  { %v1142_v62 = vsel %vm5434_vm9, %v1125_v7, 0.0  ;;  %v617_v54 = vpop.f32.mrf.mxu0  ;;  %v845_v60 = vpop.f32.mrf.mxu1  ;;  %v976_v56 = vshra.s32 %v4003_v32, 3  ;;  %v416_v33 = vadd.f32 %v3744_v21, %v3742_v20  ;;  %v5527_v18 = vsel %vm4206_vm6, 4294967295, %v5526_v18 }
  0xf2   :  { %v4052_v3 = vadd.f32 %v3942_v23, %v906_v1  ;;  %v909_v27 = vadd.f32 %v3192_v9, %v681_v44  ;;  %v680_v34 = vadd.f32 %v617_v54, %v406_v55  ;;  %v1144_v12 = vadd.f32 %v1143_v41, %v1142_v62 }
  0xf3   :  { %v3167_v22 = vpop.f32.mrf.mxu0  ;;  %v3195_v7 = vpop.f32.mrf.mxu1  ;;  %v1128_v9 = vsel %vm4030_vm3, %v4024_v58, 0.0  ;;  %v5499_v54 = vand.u32 7, %v3970_v26  ;;  %v4102_v15 = vand.u32 7, %v976_v56  ;;  %v426_v56 = vadd.f32 %v3782_v40, %v3780_v39  ;;  %v5507_v40 = vld [vmem:[#allocation18_spill] sm:$0xff] }
  0xf4   :  { %v1127_v20 = vsel %vm4041_vm4, %v4052_v3, 0.0  ;;  %v683_v21 = vadd.f32 %v3167_v22, %v421_v2  ;;  %v4072_v1 = vadd.f32 %v3942_v23, %v909_v27  ;;  %v908_v62 = vadd.f32 %v845_v60, %v680_v34 }
  0xf5   :  { %v1145_v47 = vsel %vm5434_vm9, %v1127_v20, 0.0  ;;  %v627_v44 = vpop.f32.mrf.mxu0  ;;  %v855_v55 = vpop.f32.mrf.mxu1  ;;  %v1058_v2 = vmul.u32 2, %v5499_v54  ;;  %v431_v27 = vadd.f32 %v3761_v30, %v3759_v29  ;;  %v1147_v34 = vsel %vm5434_vm9, %v1128_v9, 0.0 }
  0xf6   :  { %v1146_v37 = vadd.f32 %v1145_v47, %v1144_v12  ;;  %v911_v60 = vadd.f32 %v3195_v7, %v683_v21  ;;  %v682_v41 = vadd.f32 %v627_v44, %v416_v33  ;;  %v4100_v22 = vadd.f32 %v3942_v23, %v908_v62 }
  0xf7   :  { %v3170_v29 = vpop.f32.mrf.mxu0  ;;  %v3198_v30 = vpop.f32.mrf.mxu1  ;;  %v5503_v33 = vmov 0  ;;  %v1130_v21 = vsel %vm4078_vm7, %v4072_v1, 0.0  ;;  %v1009_v39 = vmul.u32 2, %v4062_v11  ;;  %v441_v44 = vadd.f32 %v5507_v40, %v3799_v6 }
  0xf8   :  { %v1148_v12 = vadd.f32 %v1147_v34, %v1146_v37  ;;  %v4107_v7 = vadd.f32 %v3942_v23, %v911_v60  ;;  %v5504_v33 = vsel %vm4113_vm13, 4294967295, %v5503_v33  ;;  %v910_v9 = vadd.f32 %v855_v55, %v682_v41 }
  0xf9   :  { %v685_v20 = vadd.f32 %v3170_v29, %v431_v27  ;;  %v1129_v47 = vsel %vm4092_vm11, %v4100_v22, 0.0  ;;  %v637_v17 = vpop.f32.mrf.mxu0  ;;  %v865_v62 = vpop.f32.mrf.mxu1  ;;  %v436_v37 = vadd.f32 %v5509_v35, %v5508_v38  ;;  %v1008_v6 = vmul.u32 2, %v4102_v15  ;;  %v5513_v35 = vld [vmem:[#allocation26_spill] sm:$0xff] }
  0xfa   :  { %v1149_v55 = vsel %vm5434_vm9, %v1129_v47, 0.0  ;;  %v4138_v54 = vadd.f32 %v3942_v23, %v910_v9  ;;  %v684_v41 = vadd.f32 %v637_v17, %v426_v56  ;;  %v1151_v9 = vsel %vm5434_vm9, %v1130_v21, 0.0 }
  0xfb   :  { %v913_v27 = vadd.f32 %v3198_v30, %v685_v20  ;;  %v1150_v60 = vadd.f32 %v1149_v55, %v1148_v12  ;;  %v3173_v34 = vpop.f32.mrf.mxu0  ;;  %v3201_v29 = vpop.f32.mrf.mxu1  ;;  %v1132_v30 = vsel %vm4113_vm13, %v4107_v7, 0.0  ;;  %v5511_v21 = vmov 0 }
  0xfc   :  { %v1131_v20 = vsel %vm4129_vm0, %v4138_v54, 0.0  ;;  %v687_v12 = vadd.f32 %v3173_v34, %v441_v44  ;;  %v5512_v21 = vsel %vm4162_vm10, 4294967295, %v5511_v21  ;;  %v912_v40 = vadd.f32 %v865_v62, %v684_v41 }
  0xfd   :  { %v1152_v56 = vadd.f32 %v1151_v9, %v1150_v60  ;;  %v1153_v47 = vsel %vm5434_vm9, %v1131_v20, 0.0  ;;  %v4156_v17 = vadd.f32 %v3942_v23, %v913_v27  ;;  %v647_v55 = vpop.f32.mrf.mxu0  ;;  %v875_v38 = vpop.f32.mrf.mxu1  ;;  %v451_v44 = vadd.f32 %v5514_v63, %v5513_v35 }
  0xfe   :  { %v5517_v27 = vmov 0  ;;  %v915_v53 = vadd.f32 %v3201_v29, %v687_v12  ;;  %v686_v16 = vadd.f32 %v647_v55, %v436_v37  ;;  %v1076_v60 = vadd.s32 %v3729_v14, %v1058_v2  ;;  %v5523_v12 = vld [vmem:[#allocation30_spill] sm:$0xff] }
  0xff   :  { %v5518_v27 = vsel %vm4172_vm8, 4294967295, %v5517_v27  ;;  %v1154_v34 = vadd.f32 %v1153_v47, %v1152_v56  ;;  %v4178_v62 = vadd.f32 %v3942_v23, %v912_v40  ;;  %v3176_v41 = vpop.f32.mrf.mxu0  ;;  %v3204_v9 = vpop.f32.mrf.mxu1  ;;  %v1025_v63 = vadd.s32 %v3718_v8, %v1008_v6  ;;  %v5524_v56 = vld [vmem:[#allocation31_spill] sm:$0xff]  ;;  %v5528_v40 = vld [vmem:[#allocation33_spill] sm:$0xff]  ;;  %v5529_v55 = vld [vmem:[#allocation34_spill] sm:$0xff] }
 0x100   :  { %v1155_v59 = vsel %vm5434_vm9, %v1132_v30, 0.0  ;;  %v4184_v20 = vadd.f32 %v3942_v23, %v915_v53  ;;  %v5521_v2 = vmov 0  ;;  %v914_v37 = vadd.f32 %v875_v38, %v686_v16  ;;  %v5530_v16 = vld [vmem:[#allocation37_spill] sm:$0xff] }
 0x101   :  { %v5522_v2 = vsel %vm4190_vm1, 4294967295, %v5521_v2  ;;  %v689_v29 = vadd.f32 %v3176_v41, %v451_v44  ;;  %v446_v6 = vadd.f32 %v5524_v56, %v5523_v12  ;;  %v1134_v14 = vsel %vm4162_vm10, %v4156_v17, 0.0  ;;  %v657_v30 = vpop.f32.mrf.mxu0  ;;  %v885_v47 = vpop.f32.mrf.mxu1 }
 0x102   :  { %v1133_v49 = vsel %vm4172_vm8, %v4178_v62, 0.0  ;;  %v1156_v57 = vadd.f32 %v1155_v59, %v1154_v34  ;;  %v461_v38 = vadd.f32 %v5529_v55, %v5528_v40  ;;  %v4214_v44 = vadd.f32 %v3942_v23, %v914_v37  ;;  %v5531_v34 = vld [vmem:[#allocation38_spill] sm:$0xff] }
 0x103   :  { %v1157_v35 = vsel %vm5434_vm9, %v1133_v49, 0.0  ;;  %v917_v53 = vadd.f32 %v3204_v9, %v689_v29  ;;  %v456_v4 = vadd.f32 %v5531_v34, %v5530_v16  ;;  %v688_v51 = vadd.f32 %v657_v30, %v446_v6  ;;  %v3179_v59 = vpop.f32.mrf.mxu0  ;;  %v3207_v12 = vpop.f32.mrf.mxu1 }
 0x104   :  { %v1158_v41 = vadd.f32 %v1157_v35, %v1156_v57  ;;  %v1026_v56 = vadd.s32 %v3718_v8, %v1009_v39  ;;  %v1159_v26 = vsel %vm5434_vm9, %v1134_v14, 0.0  ;;  %v1136_v40 = vsel %vm4190_vm1, %v4184_v20, 0.0 }
 0x105   :  { %v1135_v37 = vsel %vm4206_vm6, %v4214_v44, 0.0  ;;  %v691_v9 = vadd.f32 %v3179_v59, %v461_v38  ;;  %v4228_v6 = vadd.f32 %v3942_v23, %v917_v53  ;;  %v5534_v8 = vmov 0  ;;  %v667_v14 = vpop.f32.mrf.mxu0 }
 0x106   :  { %v1160_v29 = vadd.f32 %v1159_v26, %v1158_v41  ;;  %v1161_v49 = vsel %vm5434_vm9, %v1135_v37, 0.0  ;;  %v5535_v8 = vsel %vm4234_vm2, 4294967295, %v5534_v8  ;;  %v916_v39 = vadd.f32 %v885_v47, %v688_v51  ;;  %v895_v47 = vpop.f32.mrf.mxu1 }
 0x107   :  { %vm5536_vm1 = vcmp.le.s32.totalorder %v4016_v52, 12  ;;  %vm5537_vm6 = vcmp.le.s32.totalorder %v4046_v10, 12  ;;  %v919_v57 = vadd.f32 %v3207_v12, %v691_v9  ;;  %v690_v30 = vadd.f32 %v667_v14, %v456_v4 }
 0x108   :  { %vm4242_vm10 = vmand %vm5537_vm6, %vm5536_vm1  ;;  %vm1091_vm9 = vcmp.le.s32.totalorder %v1025_v63, 12  ;;  %vm1107_vm8 = vcmp.le.s32.totalorder %v1075_v28, 12  ;;  %v1162_v31 = vadd.f32 %v1161_v49, %v1160_v29  ;;  %v4247_v25 = vadd.f32 %v3942_v23, %v916_v39 }
 0x109   :  { %vm1092_vm5 = vcmp.le.s32.totalorder %v1026_v56, 12  ;;  %vm1108_vm12 = vcmp.le.s32.totalorder %v1076_v60, 12  ;;  %vm5540_vm13 = vcmask 523264   ;;  %v918_v52 = vadd.f32 %v895_v47, %v690_v30  ;;  %vm4259_vm1 = vmand %vm1091_vm9, %vm1107_vm8 }
 0x10a   :  { %v1163_v55 = vsel %vm5540_vm13, %v1136_v40, 0.0  ;;  %v1138_v10 = vsel %vm4234_vm2, %v4228_v6, 0.0  ;;  %v1137_v38 = vsel %vm4242_vm10, %v4247_v25, 0.0  ;;  %v4257_v28 = vadd.f32 %v3942_v23, %v919_v57  ;;  %vm5543_vm6 = vmmov %vm5540_vm13 }
 0x10b   :  { %v1164_v63 = vadd.f32 %v1163_v55, %v1162_v31  ;;  %v1165_v60 = vsel %vm5543_vm6, %v1137_v38, 0.0  ;;  %vm4264_vm13 = vmand %vm1092_vm5, %vm1108_vm12  ;;  %v4269_v16 = vadd.f32 %v3942_v23, %v918_v52  ;;  %vm5438_vm5 = vcmask 261120  }
 0x10c   :  { %vm5546_vm2 = vmmov %vm5543_vm6  ;;  %v1140_v51 = vsel %vm4264_vm13, %v4257_v28, 0.0  ;;  %vm1205_vm12 = vcmask 392192  }
 0x10d   :  { %v1166_v34 = vadd.f32 %v1165_v60, %v1164_v63  ;;  %v1167_v4 = vsel %vm5546_vm2, %v1138_v10, 0.0  ;;  %v1139_v41 = vsel %vm4259_vm1, %v4269_v16, 0.0  ;;  %vm5547_vm9 = vmmov %vm5546_vm2 }
 0x10e   :  { %v1169_v12 = vsel %vm5547_vm9, %v1139_v41, 0.0  ;;  %vm5548_vm8 = vmmov %vm5546_vm2  ;;  %vm5549_vm2 = vcmask 130048  }
 0x10f   :  { %v1168_v59 = vadd.f32 %v1167_v4, %v1166_v34  ;;  %v1171_v40 = vsel %vm5548_vm8, %v1140_v51, 0.0  ;;  %v4289_v34 = vsub.s32 0, %v3668_v43  ;;  %vm5550_vm9 = vmmov %vm5543_vm6 }
 0x111   :  { %v1170_v56 = vadd.f32 %v1169_v12, %v1168_v59 }
 0x113   :  { %v1172_v37 = vadd.f32 %v1171_v40, %v1170_v56 }
 0x115   :  { %v1173_v23 = vrot.slane %v1172_v37, 4 }
 0x117   :  { %v1174_v9 = vadd.f32 %v1173_v23, %v1172_v37 }
 0x119   :  { %v1175_v29 = vrot.slane %v1174_v9, 2 }
 0x11b   :  { %v1176_v49 = vadd.f32 %v1175_v29, %v1174_v9 }
 0x11d   :  { %v1177_v39 = vrot.slane %v1176_v49, 1 }
 0x11f   :  { %v1178_v14 = vadd.f32 %v1177_v39, %v1176_v49 }
 0x121   :  { %1188 = vrot.lane.b32.xlu1 %v1178_v14, %s3379_s2  ;;  %1180 = vrot.lane.b32.xlu0 %v1178_v14, %s3380_s23 }
 0x125   :  { %1184 = vrot.lane.b32.xlu0 %v1178_v14, %s3381_s24 }
 0x193   :  { %v1181_v57 = vpop.permute.xlu0 %1180  ;;  %v1189_v55 = vpop.permute.xlu1 %1188 }
 0x194   :  { %v1183_v30 = vadd.f32 %v1181_v57, %v1178_v14 }
 0x197   :  { %v1185_v31 = vpop.permute.xlu0 %1184 }
 0x198   :  { %v1187_v47 = vadd.f32 %v1185_v31, %v1183_v30 }
 0x19a   :  { %v1191_v52 = vadd.f32 %v1189_v55, %v1187_v47 }
 0x19c   :  { %1196 = vrot.lane.b32.xlu0 %v1191_v52, %s3382_s25  ;;  %1193 = vrot.lane.b32.xlu1 %v1191_v52, %s3383_s26 }
 0x1a0   :  { %1199 = vrot.lane.b32.xlu1 %v1191_v52, %s3384_s27 }
 0x20e   :  { %v1194_v10 = vpop.permute.xlu1 %1193  ;;  %v1197_v38 = vpop.permute.xlu0 %1196 }
 0x20f   :  { %v1202_v63 = vsel %vm5549_vm2, %v1191_v52, %v1194_v10  ;;  %vm5559_vm2 = vnez %v5512_v21 }
 0x210   :  { %v1204_v60 = vsel %vm5438_vm5, %v1202_v63, %v1197_v38 }
 0x212   :  { %v1200_v4 = vpop.permute.xlu1 %1199 }
 0x213   :  { %v1206_v41 = vsel %vm1205_vm12, %v1204_v60, %v1200_v4 }
 0x214   :  { %v1207_v51 = vmul.f32 0.00295858, %v1206_v41 }
 0x216   :  { %v1211_v59 = vrot.slane %v1207_v51, %v4289_v34 }
 0x218   :  { %v4294_v12 = vsub.f32 %v4008_v24, %v1211_v59  ;;  %v4297_v56 = vsub.f32 %v3975_v50, %v1211_v59  ;;  %v4300_v40 = vsub.f32 %v4052_v3, %v1211_v59  ;;  %v4303_v37 = vsub.f32 %v4024_v58, %v1211_v59 }
 0x219   :  { %v4310_v29 = vsub.f32 %v4100_v22, %v1211_v59  ;;  %v4315_v50 = vsub.f32 %v4072_v1, %v1211_v59  ;;  %v4324_v39 = vsub.f32 %v4138_v54, %v1211_v59  ;;  %v4333_v30 = vsub.f32 %v4107_v7, %v1211_v59 }
 0x21a   :  { %v1228_v23 = vmul.f32 %v4294_v12, %v4294_v12  ;;  %v1229_v9 = vmul.f32 %v4297_v56, %v4297_v56  ;;  %v1230_v24 = vmul.f32 %v4300_v40, %v4300_v40  ;;  %v1231_v3 = vmul.f32 %v4303_v37, %v4303_v37 }
 0x21b   :  { %v1232_v22 = vmul.f32 %v4310_v29, %v4310_v29  ;;  %v1233_v45 = vmul.f32 %v4315_v50, %v4315_v50  ;;  %v4341_v47 = vsub.f32 %v4178_v62, %v1211_v59  ;;  %v1234_v19 = vmul.f32 %v4324_v39, %v4324_v39 }
 0x21c   :  { %v1244_v58 = vsel %vm3989_vm15, %v1228_v23, 0.0  ;;  %v1245_v49 = vsel %vm3981_vm14, %v1229_v9, 0.0  ;;  %v1246_v14 = vsel %vm4041_vm4, %v1230_v24, 0.0  ;;  %v1247_v48 = vsel %vm4030_vm3, %v1231_v3, 0.0  ;;  %vm5551_vm14 = vmmov %vm5543_vm6 }
 0x21d   :  { %v1260_v1 = vsel %vm5543_vm6, %v1244_v58, 0.0  ;;  %v1261_v57 = vsel %vm5550_vm9, %v1245_v49, 0.0  ;;  %v1263_v31 = vsel %vm5551_vm14, %v1246_v14, 0.0  ;;  %v1248_v55 = vsel %vm4092_vm11, %v1232_v22, 0.0  ;;  %vm5552_vm15 = vmmov %vm5543_vm6 }
 0x21e   :  { %v1262_v54 = vadd.f32 %v1261_v57, %v1260_v1  ;;  %v1265_v52 = vsel %vm5552_vm15, %v1247_v48, 0.0  ;;  %v4349_v10 = vsub.f32 %v4156_v17, %v1211_v59  ;;  %v1235_v46 = vmul.f32 %v4333_v30, %v4333_v30  ;;  %vm5553_vm3 = vmmov %vm5543_vm6 }
 0x21f   :  { %v1249_v38 = vsel %vm4078_vm7, %v1233_v45, 0.0  ;;  %v1267_v63 = vsel %vm5553_vm3, %v1248_v55, 0.0  ;;  %v4357_v60 = vsub.f32 %v4214_v44, %v1211_v59  ;;  %v1236_v5 = vmul.f32 %v4341_v47, %v4341_v47  ;;  %vm5554_vm4 = vmmov %vm5553_vm3 }
 0x220   :  { %v1264_v7 = vadd.f32 %v1263_v31, %v1262_v54  ;;  %v1250_v4 = vsel %vm4129_vm0, %v1234_v19, 0.0  ;;  %v1269_v41 = vsel %vm5554_vm4, %v1249_v38, 0.0  ;;  %v4365_v51 = vsub.f32 %v4184_v20, %v1211_v59  ;;  %vm5556_vm11 = vmmov %vm5553_vm3 }
 0x221   :  { %v1237_v61 = vmul.f32 %v4349_v10, %v4349_v10  ;;  %vm5555_vm7 = vnez %v5504_v33  ;;  %v1271_v9 = vsel %vm5556_vm11, %v1250_v4, 0.0  ;;  %v4373_v24 = vsub.f32 %v4247_v25, %v1211_v59  ;;  %vm5558_vm8 = vmmov %vm5553_vm3 }
 0x222   :  { %v1266_v62 = vadd.f32 %v1265_v52, %v1264_v7  ;;  %v1251_v23 = vsel %vm5555_vm7, %v1235_v46, 0.0  ;;  %v1238_v42 = vmul.f32 %v4357_v60, %v4357_v60  ;;  %vm5557_vm0 = vnez %v5518_v27  ;;  %vm5560_vm6 = vmmov %vm5553_vm3 }
 0x223   :  { %v1252_v3 = vsel %vm5557_vm0, %v1236_v5, 0.0  ;;  %v1273_v58 = vsel %vm5558_vm8, %v1251_v23, 0.0  ;;  %v4381_v49 = vsub.f32 %v4228_v6, %v1211_v59  ;;  %v1239_v33 = vmul.f32 %v4365_v51, %v4365_v51  ;;  %vm5562_vm14 = vmmov %vm5553_vm3 }
 0x224   :  { %v1268_v17 = vadd.f32 %v1267_v63, %v1266_v62  ;;  %v1253_v22 = vsel %vm5559_vm2, %v1237_v61, 0.0  ;;  %v1275_v14 = vsel %vm5560_vm6, %v1252_v3, 0.0  ;;  %v4389_v1 = vsub.f32 %v4269_v16, %v1211_v59  ;;  %vm5564_vm4 = vmmov %vm5553_vm3 }
 0x225   :  { %v1240_v27 = vmul.f32 %v4373_v24, %v4373_v24  ;;  %vm5561_vm9 = vnez %v5527_v18  ;;  %v1277_v45 = vsel %vm5562_vm14, %v1253_v22, 0.0  ;;  %v4397_v48 = vsub.f32 %v4257_v28, %v1211_v59  ;;  %vm5566_vm11 = vmmov %vm5553_vm3  ;;  %v2844_v22 = vld [vmem:[%s5377_s5 + $0x78] sm:$0xff] }
 0x226   :  { %v1270_v44 = vadd.f32 %v1269_v41, %v1268_v17  ;;  %v1254_v57 = vsel %vm5561_vm9, %v1238_v42, 0.0  ;;  %v1241_v21 = vmul.f32 %v4381_v49, %v4381_v49  ;;  %vm5563_vm15 = vnez %v5522_v2  ;;  %vm5567_vm0 = vmmov %vm5553_vm3  ;;  %3208 = vmatprep.subr.mxu0 %v2844_v22 }
 0x227   :  { %v1255_v54 = vsel %vm5563_vm15, %v1239_v33, 0.0  ;;  %v1279_v31 = vsel %vm5553_vm3, %v1254_v57, 0.0  ;;  %v1242_v19 = vmul.f32 %v4389_v1, %v4389_v1  ;;  %v1256_v18 = vsel %vm4242_vm10, %v1240_v27, 0.0  ;;  %vm5568_vm10 = vmmov %vm5567_vm0  ;;  %v1459_v27 = vld [vmem:[%s5377_s5 + $0x30] sm:$0xff]  ;;  %3209 = vmatpush3.msra.mxu0 %v2844_v22  ;;  %v2842_v57 = vld [vmem:[%s5377_s5 + $0x68] sm:$0xff] }
 0x228   :  { %v1272_v20 = vadd.f32 %v1271_v9, %v1270_v44  ;;  %v1281_v7 = vsel %vm5564_vm4, %v1255_v54, 0.0  ;;  %v1243_v28 = vmul.f32 %v4397_v48, %v4397_v48  ;;  %vm5565_vm7 = vnez %v5535_v8  ;;  %vm5569_vm8 = vmmov %vm5567_vm0  ;;  %v2840_v54 = vld [vmem:[%s5377_s5 + $0x58] sm:$0xff] }
 0x229   :  { %v1257_v59 = vsel %vm5565_vm7, %v1241_v21, 0.0  ;;  %v1283_v52 = vsel %vm5566_vm11, %v1256_v18, 0.0  ;;  %v1258_v46 = vsel %vm4259_vm1, %v1242_v19, 0.0  ;;  %v1457_v21 = vld [vmem:[%s5377_s5 + $0x20] sm:$0xff]  ;;  %v1455_v19 = vld [vmem:[%s5377_s5 + $0x10] sm:$0xff]  ;;  %v2838_v18 = vld [vmem:[%s5377_s5 + $0x48] sm:$0xff] }
 0x22a   :  { %v1274_v25 = vadd.f32 %v1273_v58, %v1272_v20  ;;  %v1285_v62 = vsel %vm5567_vm0, %v1257_v59, 0.0  ;;  %v1259_v26 = vsel %vm4264_vm13, %v1243_v28, 0.0  ;;  %v1287_v5 = vsel %vm5568_vm10, %v1258_v46, 0.0  ;;  %v1453_v28 = vld [vmem:[%s5377_s5] sm:$0xff]  ;;  %v4483_v59 = vld [vmem:[%s5377_s5 + $0xb8] sm:$0xff]  ;;  %vm5570_vm1 = vmmov %vm5567_vm0 }
 0x22b   :  { %v1289_v17 = vsel %vm5569_vm8, %v1259_v26, 0.0  ;;  %vm5571_vm13 = vmmov %vm5567_vm0  ;;  %vm5572_vm2 = vcmask 130048  }
 0x22c   :  { %v1276_v6 = vadd.f32 %v1275_v14, %v1274_v25  ;;  %v1460_v25 = vld [vmem:[%s5377_s5 + $0x38] sm:$0xff]  ;;  %v2843_v14 = vld [vmem:[%s5377_s5 + $0x70] sm:$0xff]  ;;  %vm5573_vm3 = vmmov %vm5567_vm0 }
 0x22d   :  { %3248 = vmatprep.subr.mxu1 %v1460_v25  ;;  %3210 = vmatprep.subr.mxu0 %v2843_v14  ;;  %vm5574_vm4 = vmmov %vm5567_vm0 }
 0x22e   :  { %v1278_v16 = vadd.f32 %v1277_v45, %v1276_v6  ;;  %3249 = vmatpush3.msra.mxu1 %v1460_v25  ;;  %v1458_v6 = vld [vmem:[%s5377_s5 + $0x28] sm:$0xff]  ;;  %3211 = vmatpush3.msra.mxu0 %v2843_v14  ;;  %v2841_v45 = vld [vmem:[%s5377_s5 + $0x60] sm:$0xff]  ;;  %vm5575_vm11 = vmmov %vm5567_vm0 }
 0x22f   :  { %3250 = vmatprep.subr.mxu1 %v1459_v27  ;;  %3212 = vmatprep.subr.mxu0 %v2842_v57 }
 0x230   :  { %v1280_v55 = vadd.f32 %v1279_v31, %v1278_v16  ;;  %3251 = vmatpush3.msra.mxu1 %v1459_v27  ;;  %3213 = vmatpush3.msra.mxu0 %v2842_v57  ;;  %v1456_v16 = vld [vmem:[%s5377_s5 + $0x18] sm:$0xff]  ;;  %v2839_v31 = vld [vmem:[%s5377_s5 + $0x50] sm:$0xff] }
 0x231   :  { %3252 = vmatprep.subr.mxu1 %v1458_v6  ;;  %3214 = vmatprep.subr.mxu0 %v2841_v45 }
 0x232   :  { %v1282_v2 = vadd.f32 %v1281_v7, %v1280_v55  ;;  %3253 = vmatpush3.msra.mxu1 %v1458_v6  ;;  %3215 = vmatpush3.msra.mxu0 %v2841_v45  ;;  %v1454_v55 = vld [vmem:[%s5377_s5 + $0x8] sm:$0xff]  ;;  %v2837_v7 = vld [vmem:[%s5377_s5 + $0x40] sm:$0xff] }
 0x233   :  { %3254 = vmatprep.subr.mxu1 %v1457_v21  ;;  %3216 = vmatprep.subr.mxu0 %v2840_v54 }
 0x234   :  { %v1284_v38 = vadd.f32 %v1283_v52, %v1282_v2  ;;  %3255 = vmatpush3.msra.mxu1 %v1457_v21  ;;  %3217 = vmatpush3.msra.mxu0 %v2840_v54  ;;  %v4489_v2 = vld [vmem:[%s5377_s5 + $0xf8] sm:$0xff]  ;;  %v3385_v52 = vmov 0.0  }
 0x235   :  { %3256 = vmatprep.subr.mxu1 %v1456_v16  ;;  %3218 = vmatprep.subr.mxu0 %v2839_v31  ;;  %1435 = vst.msk [vmem:[#allocation2 + $0x80] sm:$0xff] %vm5570_vm1, %v3385_v52  ;;  %vm5576_vm1 = vmmov %vm5567_vm0 }
 0x236   :  { %v1286_v63 = vadd.f32 %v1285_v62, %v1284_v38  ;;  %3257 = vmatpush3.msra.mxu1 %v1456_v16  ;;  %3219 = vmatpush3.msra.mxu0 %v2839_v31  ;;  %1436 = vst.msk [vmem:[#allocation2 + $0x88] sm:$0xff] %vm5571_vm13, %v3385_v52  ;;  %vm5577_vm13 = vmmov %vm5567_vm0 }
 0x237   :  { %3258 = vmatprep.subr.mxu1 %v1455_v19  ;;  %3220 = vmatprep.subr.mxu0 %v2838_v18 }
 0x238   :  { %v1288_v4 = vadd.f32 %v1287_v5, %v1286_v63  ;;  %3259 = vmatpush3.msra.mxu1 %v1455_v19  ;;  %3221 = vmatpush3.msra.mxu0 %v2838_v18 }
 0x239   :  { %3260 = vmatprep.subr.mxu1 %v1454_v55  ;;  %3222 = vmatprep.subr.mxu0 %v2837_v7 }
 0x23a   :  { %v1290_v8 = vadd.f32 %v1289_v17, %v1288_v4  ;;  %3261 = vmatpush3.msra.mxu1 %v1454_v55  ;;  %3223 = vmatpush3.msra.mxu0 %v2837_v7 }
 0x23b   :  { %3262 = vmatprep.subr.mxu1 %v1453_v28  ;;  %3288 = vmatprep.subr.mxu0 %v4483_v59 }
 0x23c   :  { %v1291_v41 = vrot.slane %v1290_v8, 4  ;;  %3263 = vmatpush3.msra.mxu1 %v1453_v28 }
 0x23d   :  { %3328 = vmatprep.subr.mxu1 %v4489_v2 }
 0x23e   :  { %v1292_v61 = vadd.f32 %v1291_v41, %v1290_v8  ;;  %v1326_v8 = vld [vmem:[%s5378_s3] sm:$0x1] }
 0x240   :  { %v1293_v23 = vrot.slane %v1292_v61, 2 }
 0x242   :  { %v1294_v44 = vadd.f32 %v1293_v23, %v1292_v61 }
 0x244   :  { %v1295_v9 = vrot.slane %v1294_v44, 1 }
 0x246   :  { %v1296_v35 = vadd.f32 %v1295_v9, %v1294_v44  ;;  %v4507_v44 = vld [vmem:[%s5379_s4] ss:$0 sm:$0xff] }
 0x248   :  { %1302 = vrot.lane.b32.xlu1 %v1296_v35, %s3381_s24  ;;  %1298 = vrot.lane.b32.xlu0 %v1296_v35, %s3380_s23 }
 0x24c   :  { %1306 = vrot.lane.b32.xlu0 %v1296_v35, %s3379_s2 }
 0x2ba   :  { %v1299_v53 = vpop.permute.xlu0 %1298  ;;  %v1303_v3 = vpop.permute.xlu1 %1302 }
 0x2bb   :  { %v1301_v42 = vadd.f32 %v1299_v53, %v1296_v35 }
 0x2bd   :  { %v1305_v20 = vadd.f32 %v1303_v3, %v1301_v42 }
 0x2be   :  { %v1307_v58 = vpop.permute.xlu0 %1306 }
 0x2bf   :  { %v4424_v33 = vadd.f32 %v1307_v58, %v1305_v20 }
 0x2c1   :  { %1314 = vrot.lane.b32.xlu0 %v4424_v33, %s3382_s25  ;;  %1311 = vrot.lane.b32.xlu1 %v4424_v33, %s3383_s26 }
 0x2c5   :  { %1317 = vrot.lane.b32.xlu1 %v4424_v33, %s3384_s27 }
 0x333   :  { %v1312_v46 = vpop.permute.xlu1 %1311  ;;  %v1315_v38 = vpop.permute.xlu0 %1314 }
 0x334   :  { %v1320_v62 = vsel %vm5572_vm2, %v4424_v33, %v1312_v46  ;;  %vm5578_vm2 = vmmov %vm5567_vm0 }
 0x335   :  { %v1321_v26 = vsel %vm5438_vm5, %v1320_v62, %v1315_v38 }
 0x337   :  { %v1318_v63 = vpop.permute.xlu1 %1317 }
 0x338   :  { %v1322_v5 = vsel %vm1205_vm12, %v1321_v26, %v1318_v63 }
 0x339   :  { %v1323_v4 = vmul.f32 0.00295858, %v1322_v5 }
 0x33b   :  { %v1324_v17 = vadd.f32 1e-05, %v1323_v4 }
 0x33d   :  { %3375 = vrsqrt.f32 %v1324_v17 }
 0x34a   :  { %v3376_v41 = vpop.eup %3375 }
 0x34b   :  { %v1327_v61 = vmul.f32 %v3376_v41, %v1326_v8 }
 0x34d   :  { %v4502_v23 = vrot.slane %v1327_v61, %v4289_v34 }
 0x34f   :  { %v1332_v9 = vmul.f32 %v4502_v23, %v4294_v12  ;;  %v1333_v35 = vmul.f32 %v4502_v23, %v4297_v56  ;;  %v1334_v53 = vmul.f32 %v4502_v23, %v4300_v40  ;;  %v1335_v42 = vmul.f32 %v4502_v23, %v4303_v37 }
 0x350   :  { %v1336_v3 = vmul.f32 %v4502_v23, %v4310_v29  ;;  %v1337_v20 = vmul.f32 %v4502_v23, %v4315_v50  ;;  %v1338_v58 = vmul.f32 %v4502_v23, %v4324_v39  ;;  %v1339_v12 = vmul.f32 %v4502_v23, %v4333_v30 }
 0x351   :  { %v1355_v56 = vadd.f32 %v4507_v44, %v1332_v9  ;;  %v1356_v33 = vadd.f32 %v4507_v44, %v1333_v35  ;;  %v1357_v40 = vadd.f32 %v4507_v44, %v1334_v53  ;;  %v1358_v37 = vadd.f32 %v4507_v44, %v1335_v42 }
 0x352   :  { %v1359_v22 = vadd.f32 %v4507_v44, %v1336_v3  ;;  %v1360_v29 = vadd.f32 %v4507_v44, %v1337_v20  ;;  %v1361_v50 = vadd.f32 %v4507_v44, %v1338_v58  ;;  %v1362_v25 = vadd.f32 %v4507_v44, %v1339_v12 }
 0x353   :  { %vm1371_vm12 = vcmp.gt.f32.partialorder %v1355_v56, 0.0  ;;  %vm1372_vm6 = vcmp.gt.f32.partialorder %v1356_v33, 0.0  ;;  %v1387_v39 = vmul.f32 0.2, %v1355_v56  ;;  %v1388_v30 = vmul.f32 0.2, %v1356_v33 }
 0x354   :  { %vm1373_vm9 = vcmp.gt.f32.partialorder %v1357_v40, 0.0  ;;  %v1389_v14 = vmul.f32 0.2, %v1357_v40  ;;  %vm1374_vm14 = vcmp.gt.f32.partialorder %v1358_v37, 0.0  ;;  %v1390_v27 = vmul.f32 0.2, %v1358_v37 }
 0x355   :  { %v1403_v57 = vsel %vm1371_vm12, %v1355_v56, %v1387_v39  ;;  %v1404_v6 = vsel %vm1372_vm6, %v1356_v33, %v1388_v30  ;;  %vm1375_vm15 = vcmp.gt.f32.partialorder %v1359_v22, 0.0  ;;  %v1391_v45 = vmul.f32 0.2, %v1359_v22  ;;  %vm5579_vm12 = vmmov %vm5567_vm0  ;;  %v2907_v56 = vld [vmem:[%s5377_s5 + $0xf0] sm:$0xff]  ;;  %v2882_v30 = vld [vmem:[%s5377_s5 + $0xa8] sm:$0xff] }
 0x356   :  { %1419 = vst.msk [vmem:[#allocation2] sm:$0xff] %vm5573_vm3, %v1403_v57  ;;  %v1405_v21 = vsel %vm1373_vm9, %v1357_v40, %v1389_v14  ;;  %v1406_v54 = vsel %vm1374_vm14, %v1358_v37, %v1390_v27  ;;  %vm1376_vm7 = vcmp.gt.f32.partialorder %v1360_v29, 0.0  ;;  %v1392_v16 = vmul.f32 0.2, %v1360_v29  ;;  %vm5581_vm3 = vmmov %vm5567_vm0  ;;  %v2906_v14 = vld [vmem:[%s5377_s5 + $0xe8] sm:$0xff] }
 0x357   :  { %1420 = vst.msk [vmem:[#allocation2 + $0x8] sm:$0xff] %vm5574_vm4, %v1404_v6  ;;  %v1407_v31 = vsel %vm1375_vm15, %v1359_v22, %v1391_v45  ;;  %vm1377_vm10 = vcmp.gt.f32.partialorder %v1361_v50, 0.0  ;;  %v1393_v19 = vmul.f32 0.2, %v1361_v50  ;;  %vm1378_vm8 = vcmp.gt.f32.partialorder %v1362_v25, 0.0  ;;  %vm5580_vm15 = vmmov %vm5567_vm0 }
 0x358   :  { %1421 = vst.msk [vmem:[#allocation2 + $0x10] sm:$0xff] %vm5575_vm11, %v1405_v21  ;;  %v1408_v18 = vsel %vm1376_vm7, %v1360_v29, %v1392_v16  ;;  %v1394_v55 = vmul.f32 0.2, %v1362_v25  ;;  %v1340_v7 = vmul.f32 %v4502_v23, %v4341_v47  ;;  %v1341_v28 = vmul.f32 %v4502_v23, %v4349_v10  ;;  %vm5582_vm7 = vmmov %vm5567_vm0 }
 0x359   :  { %1422 = vst.msk [vmem:[#allocation2 + $0x18] sm:$0xff] %vm5567_vm0, %v1406_v54  ;;  %v1409_v52 = vsel %vm1377_vm10, %v1361_v50, %v1393_v19  ;;  %v1342_v46 = vmul.f32 %v4502_v23, %v4357_v60  ;;  %v1343_v38 = vmul.f32 %v4502_v23, %v4365_v51  ;;  %v1344_v62 = vmul.f32 %v4502_v23, %v4373_v24  ;;  %vm5583_vm11 = vmmov %vm5567_vm0  ;;  %v2881_v54 = vld [vmem:[%s5377_s5 + $0xa0] sm:$0xff] }
 0x35a   :  { %1423 = vst.msk [vmem:[#allocation2 + $0x20] sm:$0xff] %vm5576_vm1, %v1407_v31  ;;  %v1410_v26 = vsel %vm1378_vm8, %v1362_v25, %v1394_v55  ;;  %v1363_v47 = vadd.f32 %v4507_v44, %v1340_v7  ;;  %v1364_v63 = vadd.f32 %v4507_v44, %v1341_v28  ;;  %v1345_v10 = vmul.f32 %v4502_v23, %v4381_v49  ;;  %vm5584_vm10 = vmmov %vm5567_vm0  ;;  %v2905_v19 = vld [vmem:[%s5377_s5 + $0xe0] sm:$0xff]  ;;  %v2880_v7 = vld [vmem:[%s5377_s5 + $0x98] sm:$0xff] }
 0x35b   :  { %1424 = vst.msk [vmem:[#allocation2 + $0x28] sm:$0xff] %vm5577_vm13, %v1408_v18  ;;  %v1365_v60 = vadd.f32 %v4507_v44, %v1342_v46  ;;  %v1366_v5 = vadd.f32 %v4507_v44, %v1343_v38  ;;  %v1367_v51 = vadd.f32 %v4507_v44, %v1344_v62  ;;  %v1346_v24 = vmul.f32 %v4502_v23, %v4389_v1  ;;  %v2883_v1 = vld [vmem:[%s5377_s5 + $0xb0] sm:$0xff]  ;;  %vm5585_vm1 = vmmov %vm5567_vm0  ;;  %v2904_v46 = vld [vmem:[%s5377_s5 + $0xd8] sm:$0xff] }
 0x35c   :  { %1425 = vst.msk [vmem:[#allocation2 + $0x30] sm:$0xff] %vm5578_vm2, %v1409_v52  ;;  %vm1379_vm6 = vcmp.gt.f32.partialorder %v1363_v47, 0.0  ;;  %v1395_v4 = vmul.f32 0.2, %v1363_v47  ;;  %vm1380_vm9 = vcmp.gt.f32.partialorder %v1364_v63, 0.0  ;;  %v1368_v9 = vadd.f32 %v4507_v44, %v1345_v10  ;;  %vm5586_vm13 = vmmov %vm5567_vm0  ;;  %v2903_v10 = vld [vmem:[%s5377_s5 + $0xd0] sm:$0xff] }
 0x35d   :  { %1426 = vst.msk [vmem:[#allocation2 + $0x38] sm:$0xff] %vm5579_vm12, %v1410_v26  ;;  %v1396_v17 = vmul.f32 0.2, %v1364_v63  ;;  %v1437_v41 = vld [vmem:[#allocation2] sm:$0xff]  ;;  %vm1381_vm14 = vcmp.gt.f32.partialorder %v1365_v60, 0.0  ;;  %v1369_v35 = vadd.f32 %v4507_v44, %v1346_v24  ;;  %vm1382_vm4 = vcmp.gt.f32.partialorder %v1366_v5, 0.0  ;;  %vm5587_vm2 = vmmov %vm5567_vm0 }
 0x35e   :  { %v1461_v8 = vld [vmem:[#allocation2 + $0x1] sm:$0xff]  ;;  %v1397_v49 = vmul.f32 0.2, %v1365_v60  ;;  %3264 = vmatprep.mubr.msk.f32.mxu1 %vm5581_vm3, %v1437_v41  ;;  %v1411_v42 = vsel %vm1379_vm6, %v1363_v47, %v1395_v4  ;;  %v1398_v20 = vmul.f32 0.2, %v1366_v5  ;;  %vm1383_vm8 = vcmp.gt.f32.partialorder %v1367_v51, 0.0  ;;  %vm5591_vm3 = vmmov %vm5567_vm0 }
 0x35f   :  { %v4560_v61 = vld [vmem:[#allocation2 + $0x8] sm:$0xff]  ;;  %3224 = vmatprep.mubr.msk.f32.mxu0 %vm5580_vm15, %v1461_v8  ;;  %v1412_v3 = vsel %vm1380_vm9, %v1364_v63, %v1396_v17  ;;  %v4577_v12 = vld [vmem:[#allocation2 + $0x10] sm:$0xff]  ;;  %1427 = vst.msk [vmem:[#allocation2 + $0x40] sm:$0xff] %vm5567_vm0, %v1411_v42  ;;  %v1399_v40 = vmul.f32 0.2, %v1367_v51  ;;  %v1347_v37 = vmul.f32 %v4502_v23, %v4397_v48  ;;  %vm1384_vm12 = vcmp.gt.f32.partialorder %v1368_v9, 0.0  ;;  %vm5588_vm9 = vmmov %vm5567_vm0 }
 0x360   :  { %v4566_v53 = vld [vmem:[#allocation2 + $0x9] sm:$0xff]  ;;  %3265 = vmatmul.mubr.msk.f32.vlgmr.msra.gmra.mxu1 %vm5583_vm11, %v4560_v61  ;;  %v4575_v58 = vld [vmem:[#allocation2 + $0x11] sm:$0xff]  ;;  %1428 = vst.msk [vmem:[#allocation2 + $0x48] sm:$0xff] %vm5584_vm10, %v1412_v3  ;;  %v1413_v33 = vsel %vm1381_vm14, %v1365_v60, %v1397_v49  ;;  %v1414_v22 = vsel %vm1382_vm4, %v1366_v5, %v1398_v20  ;;  %v1400_v29 = vmul.f32 0.2, %v1368_v9  ;;  %vm1385_vm6 = vcmp.gt.f32.partialorder %v1369_v35, 0.0  ;;  %vm5589_vm14 = vmmov %vm5567_vm0 }
 0x361   :  { %3225 = vmatmul.mubr.msk.f32.vlgmr.msra.gmra.mxu0 %vm5582_vm7, %v4566_v53  ;;  %3267 = vmatprep.mubr.msk.f32.mxu1 %vm5586_vm13, %v4577_v12  ;;  %1429 = vst.msk [vmem:[#allocation2 + $0x50] sm:$0xff] %vm5587_vm2, %v1413_v33  ;;  %v1415_v48 = vsel %vm1383_vm8, %v1367_v51, %v1399_v40  ;;  %v1401_v23 = vmul.f32 0.2, %v1369_v35  ;;  %v1370_v50 = vadd.f32 %v4507_v44, %v1347_v37  ;;  %v4597_v25 = vld [vmem:[#allocation2 + $0x19] sm:$0xff]  ;;  %vm5590_vm15 = vmmov %vm5567_vm0  ;;  %v2879_v26 = vld [vmem:[%s5377_s5 + $0x90] sm:$0xff] }
 0x362   :  { %3227 = vmatprep.mubr.msk.f32.mxu0 %vm5585_vm1, %v4575_v58  ;;  %3289 = vmatpush3.msra.mxu0 %v4483_v59  ;;  %1430 = vst.msk [vmem:[#allocation2 + $0x58] sm:$0xff] %vm5588_vm9, %v1414_v22  ;;  %v4599_v39 = vld [vmem:[#allocation2 + $0x18] sm:$0xff]  ;;  %v1416_v59 = vsel %vm1384_vm12, %v1368_v9, %v1400_v29  ;;  %v4611_v44 = vld [vmem:[#allocation2 + $0x20] sm:$0xff]  ;;  %vm5592_vm4 = vmmov %vm5567_vm0 }
 0x363   :  { %3329 = vmatpush3.msra.mxu1 %v4489_v2  ;;  %3290 = vmatprep.subr.mxu0 %v2883_v1  ;;  %1431 = vst.msk [vmem:[#allocation2 + $0x60] sm:$0xff] %vm5589_vm14, %v1415_v48  ;;  %v4609_v2 = vld [vmem:[#allocation2 + $0x21] sm:$0xff]  ;;  %v1417_v27 = vsel %vm1385_vm6, %v1369_v35, %v1401_v23  ;;  %vm1386_vm7 = vcmp.gt.f32.partialorder %v1370_v50, 0.0  ;;  %v1402_v57 = vmul.f32 0.2, %v1370_v50  ;;  %vm5593_vm11 = vmmov %vm5567_vm0  ;;  %v4623_v45 = vld [vmem:[#allocation2 + $0x29] sm:$0xff] }
 0x364   :  { %3330 = vmatprep.subr.mxu1 %v2907_v56  ;;  %3268 = vmatmul.mubr.msk.f32.gmra.mxu1 %vm5591_vm3, %v4599_v39  ;;  %1432 = vst.msk [vmem:[#allocation2 + $0x68] sm:$0xff] %vm5592_vm4, %v1416_v59  ;;  %vm5594_vm10 = vmmov %vm5567_vm0  ;;  %v4625_v21 = vld [vmem:[#allocation2 + $0x28] sm:$0xff]  ;;  %v4635_v16 = vld [vmem:[#allocation2 + $0x31] sm:$0xff] }
 0x365   :  { %3228 = vmatmul.mubr.msk.f32.gmra.mxu0 %vm5590_vm15, %v4597_v25  ;;  %3270 = vmatprep.mubr.msk.f32.mxu1 %vm5567_vm0, %v4611_v44  ;;  %1433 = vst.msk [vmem:[#allocation2 + $0x70] sm:$0xff] %vm5594_vm10, %v1417_v27  ;;  %v1418_v6 = vsel %vm1386_vm7, %v1370_v50, %v1402_v57  ;;  %vm5595_vm8 = vmmov %vm5567_vm0  ;;  %v4637_v31 = vld [vmem:[#allocation2 + $0x30] sm:$0xff]  ;;  %v4648_v55 = vld [vmem:[#allocation2 + $0x38] sm:$0xff] }
 0x366   :  { %3230 = vmatprep.mubr.msk.f32.mxu0 %vm5593_vm11, %v4609_v2  ;;  %3291 = vmatpush3.msra.mxu0 %v2883_v1  ;;  %1434 = vst.msk [vmem:[#allocation2 + $0x78] sm:$0xff] %vm5595_vm8, %v1418_v6  ;;  %vm5596_vm1 = vmmov %vm5567_vm0  ;;  %v4646_v18 = vld [vmem:[#allocation2 + $0x39] sm:$0xff]  ;;  %v2878_v51 = vld [vmem:[%s5377_s5 + $0x88] sm:$0xff] }
 0x367   :  { %3331 = vmatpush3.msra.mxu1 %v2907_v56  ;;  %3292 = vmatprep.subr.mxu0 %v2882_v30  ;;  %vm5597_vm13 = vmmov %vm5567_vm0  ;;  %v4657_v28 = vld [vmem:[#allocation2 + $0x41] sm:$0xff] }
 0x368   :  { %3332 = vmatprep.subr.mxu1 %v2906_v14  ;;  %3271 = vmatmul.mubr.msk.f32.gmra.mxu1 %vm5597_vm13, %v4625_v21  ;;  %vm5598_vm2 = vmmov %vm5567_vm0  ;;  %v4659_v52 = vld [vmem:[#allocation2 + $0x40] sm:$0xff]  ;;  %v4668_v38 = vld [vmem:[#allocation2 + $0x49] sm:$0xff] }
 0x369   :  { %3231 = vmatmul.mubr.msk.f32.gmra.mxu0 %vm5596_vm1, %v4623_v45  ;;  %vm5599_vm12 = vmmov %vm5567_vm0  ;;  %3333 = vmatpush3.msra.mxu1 %v2906_v14  ;;  %v4670_v62 = vld [vmem:[#allocation2 + $0x48] sm:$0xff]  ;;  %v1471_v47 = vld [vmem:[#allocation2 + $0x51] sm:$0xff] }
 0x36a   :  { %3233 = vmatprep.mubr.msk.f32.mxu0 %vm5598_vm2, %v4635_v16  ;;  %3273 = vmatprep.mubr.msk.f32.mxu1 %vm5599_vm12, %v4637_v31  ;;  %vm5600_vm6 = vmmov %vm5567_vm0  ;;  %v1447_v63 = vld [vmem:[#allocation2 + $0x50] sm:$0xff]  ;;  %v1472_v60 = vld [vmem:[#allocation2 + $0x59] sm:$0xff] }
 0x36b   :  { %3293 = vmatpush3.msra.mxu0 %v2882_v30  ;;  %3334 = vmatprep.subr.mxu1 %v2905_v19  ;;  %vm5601_vm9 = vmmov %vm5567_vm0  ;;  %v1448_v5 = vld [vmem:[#allocation2 + $0x58] sm:$0xff]  ;;  %v1473_v24 = vld [vmem:[#allocation2 + $0x61] sm:$0xff] }
 0x36c   :  { %3294 = vmatprep.subr.mxu0 %v2881_v54  ;;  %3274 = vmatmul.mubr.msk.f32.gmra.mxu1 %vm5601_vm9, %v4648_v55  ;;  %vm5602_vm14 = vmmov %vm5567_vm0  ;;  %v1449_v4 = vld [vmem:[#allocation2 + $0x60] sm:$0xff]  ;;  %v2902_v17 = vld [vmem:[%s5377_s5 + $0xc8] sm:$0xff] }
 0x36d   :  { %3234 = vmatmul.mubr.msk.f32.gmra.mxu0 %vm5600_vm6, %v4646_v18  ;;  %vm5603_vm15 = vmmov %vm5567_vm0  ;;  %3335 = vmatpush3.msra.mxu1 %v2905_v19  ;;  %v1474_v8 = vld [vmem:[#allocation2 + $0x69] sm:$0xff]  ;;  %v2877_v49 = vld [vmem:[%s5377_s5 + $0x80] sm:$0xff] }
 0x36e   :  { %3236 = vmatprep.mubr.msk.f32.mxu0 %vm5602_vm14, %v4657_v28  ;;  %3276 = vmatprep.mubr.msk.f32.mxu1 %vm5603_vm15, %v4659_v52  ;;  %vm5604_vm3 = vmmov %vm5567_vm0  ;;  %v1450_v41 = vld [vmem:[#allocation2 + $0x68] sm:$0xff]  ;;  %v1475_v9 = vld [vmem:[#allocation2 + $0x71] sm:$0xff] }
 0x36f   :  { %3295 = vmatpush3.msra.mxu0 %v2881_v54  ;;  %3336 = vmatprep.subr.mxu1 %v2904_v46  ;;  %vm5605_vm4 = vmmov %vm5567_vm0  ;;  %v1451_v35 = vld [vmem:[#allocation2 + $0x70] sm:$0xff]  ;;  %v2901_v1 = vld [vmem:[%s5377_s5 + $0xc0] sm:$0xff] }
 0x370   :  { %3296 = vmatprep.subr.mxu0 %v2880_v7  ;;  %3277 = vmatmul.mubr.msk.f32.gmra.mxu1 %vm5605_vm4, %v4670_v62  ;;  %vm5606_vm7 = vmmov %vm5567_vm0  ;;  %v1476_v42 = vld [vmem:[#allocation2 + $0x79] sm:$0xff] }
 0x371   :  { %3237 = vmatmul.mubr.msk.f32.gmra.mxu0 %vm5604_vm3, %v4668_v38  ;;  %vm5607_vm11 = vmmov %vm5567_vm0  ;;  %3337 = vmatpush3.msra.mxu1 %v2904_v46  ;;  %v1452_v3 = vld [vmem:[#allocation2 + $0x78] sm:$0xff] }
 0x372   :  { %3239 = vmatprep.mubr.msk.f32.mxu0 %vm5606_vm7, %v1471_v47  ;;  %3279 = vmatprep.mubr.msk.f32.mxu1 %vm5607_vm11, %v1447_v63  ;;  %vm5608_vm10 = vmmov %vm5567_vm0 }
 0x373   :  { %3297 = vmatpush3.msra.mxu0 %v2880_v7  ;;  %3338 = vmatprep.subr.mxu1 %v2903_v10  ;;  %vm5609_vm8 = vmmov %vm5567_vm0 }
 0x374   :  { %3298 = vmatprep.subr.mxu0 %v2879_v26  ;;  %3280 = vmatmul.mubr.msk.f32.gmra.mxu1 %vm5608_vm10, %v1448_v5  ;;  %vm5610_vm1 = vmmov %vm5567_vm0 }
 0x375   :  { %3240 = vmatmul.mubr.msk.f32.gmra.mxu0 %vm5567_vm0, %v1472_v60  ;;  %3282 = vmatprep.mubr.msk.f32.mxu1 %vm5610_vm1, %v1449_v4  ;;  %vm5611_vm13 = vmmov %vm5567_vm0 }
 0x376   :  { %3242 = vmatprep.mubr.msk.f32.mxu0 %vm5609_vm8, %v1473_v24  ;;  %3299 = vmatpush3.msra.mxu0 %v2879_v26  ;;  %vm5612_vm2 = vmmov %vm5567_vm0 }
 0x377   :  { %3339 = vmatpush3.msra.mxu1 %v2903_v10  ;;  %3300 = vmatprep.subr.mxu0 %v2878_v51  ;;  %vm5613_vm12 = vmmov %vm5567_vm0  ;;  %v5648_v10 = vld [vmem:[#allocation4_spill] sm:$0xff] }
 0x378   :  { %3340 = vmatprep.subr.mxu1 %v2902_v17  ;;  %3283 = vmatmul.mubr.msk.f32.gmra.mxu1 %vm5612_vm2, %v1450_v41  ;;  %vm5614_vm6 = vmmov %vm5567_vm0 }
 0x379   :  { %3243 = vmatmul.mubr.msk.f32.gmra.mxu0 %vm5611_vm13, %v1474_v8  ;;  %3285 = vmatprep.mubr.msk.f32.mxu1 %vm5614_vm6, %v1451_v35  ;;  %vm5615_vm9 = vmmov %vm5567_vm0 }
 0x37a   :  { %3245 = vmatprep.mubr.msk.f32.mxu0 %vm5613_vm12, %v1475_v9  ;;  %3301 = vmatpush3.msra.mxu0 %v2878_v51  ;;  %vm5616_vm14 = vmmov %vm5567_vm0 }
 0x37b   :  { %3341 = vmatpush3.msra.mxu1 %v2902_v17  ;;  %3302 = vmatprep.subr.mxu0 %v2877_v49  ;;  %vm5617_vm15 = vmmov %vm5567_vm0 }
 0x37c   :  { %3342 = vmatprep.subr.mxu1 %v2901_v1  ;;  %3286 = vmatmul.mubr.msk.f32.gmra.mxu1 %vm5616_vm14, %v1452_v3  ;;  %vm5618_vm3 = vmmov %vm5567_vm0 }
 0x37d   :  { %3246 = vmatmul.mubr.msk.f32.gmra.mxu0 %vm5615_vm9, %v1476_v42  ;;  %3344 = vmatprep.mubr.msk.f32.mxu1 %vm5618_vm3, %v4566_v53  ;;  %vm5619_vm4 = vmmov %vm5567_vm0  ;;  %v2121_v53 = vld [vmem:[#allocation2 + $0x81] sm:$0xff] }
 0x37e   :  { %3303 = vmatpush3.msra.mxu0 %v2877_v49  ;;  %3304 = vmatprep.mubr.msk.f32.mxu0 %vm5617_vm15, %v4560_v61  ;;  %vm5620_vm7 = vmmov %vm5567_vm0  ;;  %v1887_v61 = vld [vmem:[#allocation2 + $0x80] sm:$0xff]  ;;  %v5653_v49 = vand.u32 7, %v3668_v43 }
 0x37f   :  { %3343 = vmatpush3.msra.mxu1 %v2901_v1  ;;  %vm5621_vm11 = vmmov %vm5567_vm0  ;;  %v5654_v1 = vld [vmem:[#allocation10_spill] sm:$0xff] }
 0x380   :  { %3345 = vmatmul.mubr.msk.f32.vlgmr.msra.gmra.mxu1 %vm5620_vm7, %v4575_v58  ;;  %vm5622_vm10 = vmmov %vm5567_vm0 }
 0x381   :  { %3305 = vmatmul.mubr.msk.f32.vlgmr.msra.gmra.mxu0 %vm5619_vm4, %v4577_v12  ;;  %3347 = vmatprep.mubr.msk.f32.mxu1 %vm5567_vm0, %v4597_v25  ;;  %vm5623_vm8 = vmmov %vm5567_vm0 }
 0x382   :  { %3307 = vmatprep.mubr.msk.f32.mxu0 %vm5621_vm11, %v4599_v39  ;;  %vm5624_vm1 = vmmov %vm5567_vm0 }
 0x383   :  { %vm5625_vm13 = vmmov %vm5567_vm0 }
 0x384   :  { %3348 = vmatmul.mubr.msk.f32.gmra.mxu1 %vm5623_vm8, %v4609_v2  ;;  %vm5626_vm2 = vmmov %vm5567_vm0 }
 0x385   :  { %3308 = vmatmul.mubr.msk.f32.gmra.mxu0 %vm5622_vm10, %v4611_v44  ;;  %3350 = vmatprep.mubr.msk.f32.mxu1 %vm5625_vm13, %v4623_v45  ;;  %vm5627_vm12 = vmmov %vm5567_vm0 }
 0x386   :  { %3310 = vmatprep.mubr.msk.f32.mxu0 %vm5624_vm1, %v4625_v21  ;;  %vm5628_vm6 = vmmov %vm5567_vm0 }
 0x387   :  { %vm5629_vm9 = vmmov %vm5567_vm0 }
 0x388   :  { %3351 = vmatmul.mubr.msk.f32.gmra.mxu1 %vm5627_vm12, %v4635_v16  ;;  %vm5630_vm14 = vmmov %vm5567_vm0 }
 0x389   :  { %3311 = vmatmul.mubr.msk.f32.gmra.mxu0 %vm5626_vm2, %v4637_v31  ;;  %3353 = vmatprep.mubr.msk.f32.mxu1 %vm5629_vm9, %v4646_v18  ;;  %vm5631_vm15 = vmmov %vm5567_vm0 }
 0x38a   :  { %3313 = vmatprep.mubr.msk.f32.mxu0 %vm5628_vm6, %v4648_v55  ;;  %vm5632_vm3 = vmmov %vm5567_vm0 }
 0x38b   :  { %vm5633_vm4 = vmmov %vm5567_vm0 }
 0x38c   :  { %3354 = vmatmul.mubr.msk.f32.gmra.mxu1 %vm5631_vm15, %v4657_v28  ;;  %vm5634_vm7 = vmmov %vm5567_vm0 }
 0x38d   :  { %3314 = vmatmul.mubr.msk.f32.gmra.mxu0 %vm5630_vm14, %v4659_v52  ;;  %3356 = vmatprep.mubr.msk.f32.mxu1 %vm5633_vm4, %v4668_v38  ;;  %vm5635_vm11 = vmmov %vm5567_vm0 }
 0x38e   :  { %3316 = vmatprep.mubr.msk.f32.mxu0 %vm5632_vm3, %v4670_v62  ;;  %vm5636_vm10 = vmmov %vm5567_vm0 }
 0x38f   :  { %vm5637_vm8 = vmmov %vm5567_vm0 }
 0x390   :  { %3357 = vmatmul.mubr.msk.f32.gmra.mxu1 %vm5635_vm11, %v1471_v47  ;;  %vm5638_vm1 = vmmov %vm5567_vm0  ;;  %v4803_v47 = vld [vmem:[%s5380_s6] ss:$0 sm:$0xff] }
 0x391   :  { %3317 = vmatmul.mubr.msk.f32.gmra.mxu0 %vm5634_vm7, %v1447_v63  ;;  %3359 = vmatprep.mubr.msk.f32.mxu1 %vm5636_vm10, %v1472_v60  ;;  %vm5639_vm13 = vmmov %vm5567_vm0  ;;  %v5647_v63 = vld [vmem:[#allocation8_spill] sm:$0xff]  ;;  %v5649_v60 = vand.u32 7, %v5648_v10  ;;  %vm2366_vm10 = vcmp.le.s32.totalorder %v5654_v1, 4  ;;  %v5673_v10 = vld [vmem:[#allocation19_spill] sm:$0xff] }
 0x392   :  { %3319 = vmatprep.mubr.msk.f32.mxu0 %vm5567_vm0, %v1448_v5  ;;  %vm5640_vm2 = vmmov %vm5567_vm0  ;;  %vm2364_vm4 = vcmp.le.s32.totalorder %v5647_v63, 4 }
 0x393   :  { %vm5641_vm12 = vmmov %vm5567_vm0  ;;  %vm4808_vm7 = vcmp.le.s32.totalorder %v5649_v60, 4 }
 0x394   :  { %3360 = vmatmul.mubr.msk.f32.gmra.mxu1 %vm5638_vm1, %v1473_v24  ;;  %vm5642_vm6 = vmmov %vm5567_vm0 }
 0x395   :  { %3320 = vmatmul.mubr.msk.f32.gmra.mxu0 %vm5637_vm8, %v1449_v4  ;;  %3362 = vmatprep.mubr.msk.f32.mxu1 %vm5640_vm2, %v1474_v8  ;;  %vm5643_vm9 = vmmov %vm5567_vm0  ;;  %v5652_v4 = vld [vmem:[#allocation9_spill] sm:$0xff] }
 0x396   :  { %3322 = vmatprep.mubr.msk.f32.mxu0 %vm5639_vm13, %v1450_v41  ;;  %vm5644_vm14 = vmmov %vm5567_vm0  ;;  %vm2363_vm11 = vcmp.le.s32.totalorder %v5652_v4, 4 }
 0x397   :  { %vm5645_vm15 = vmmov %vm5567_vm0 }
 0x398   :  { %3363 = vmatmul.mubr.msk.f32.gmra.mxu1 %vm5642_vm6, %v1475_v9  ;;  %vm5646_vm3 = vmmov %vm5567_vm0  ;;  %vm2379_vm0 = vcmp.le.s32.totalorder %v5653_v49, 4 }
 0x399   :  { %3323 = vmatmul.mubr.msk.f32.gmra.mxu0 %vm5641_vm12, %v1451_v35  ;;  %3365 = vmatprep.mubr.msk.f32.mxu1 %vm5644_vm14, %v1476_v42  ;;  %v5655_v42 = vld [vmem:[#allocation5_spill] sm:$0xff]  ;;  %vm4830_vm13 = vmand %vm2364_vm4, %vm4808_vm7  ;;  %vm2367_vm14 = vcmp.le.s32.totalorder %v5673_v10, 4 }
 0x39a   :  { %3325 = vmatprep.mubr.msk.f32.mxu0 %vm5643_vm9, %v1452_v3  ;;  %v5656_v3 = vand.u32 7, %v5655_v42  ;;  %vm4836_vm2 = vmand %vm2363_vm11, %vm2379_vm0  ;;  %v5678_v42 = vld [vmem:[#allocation22_spill] sm:$0xff] }
 0x39c   :  { %3366 = vmatmul.mubr.msk.f32.gmra.mxu1 %vm5646_vm3, %v2121_v53  ;;  %vm4818_vm8 = vcmp.le.s32.totalorder %v5656_v3, 4  ;;  %v5659_v53 = vld [vmem:[#allocation14_spill] sm:$0xff]  ;;  %vm2370_vm3 = vcmp.le.s32.totalorder %v5678_v42, 4 }
 0x39d   :  { %3326 = vmatmul.mubr.msk.f32.gmra.mxu0 %vm5645_vm15, %v1887_v61  ;;  %vm2365_vm1 = vcmp.le.s32.totalorder %v5659_v53, 4  ;;  %vm4883_vm7 = vmand %vm2366_vm10, %vm4818_vm8 }
 0x420   :  { %v3266_v58 = vpop.f32.mrf.mxu1 }
 0x421   :  { %v3226_v20 = vpop.f32.mrf.mxu0 }
 0x422   :  { %v1793_v56 = vpop.f32.mrf.mxu1  ;;  %v1799_v52 = vadd.f32 %v3266_v58, %v3226_v20 }
 0x423   :  { %v1600_v12 = vpop.f32.mrf.mxu0 }
 0x424   :  { %v3269_v40 = vpop.f32.mrf.mxu1  ;;  %v1794_v62 = vadd.f32 %v1793_v56, %v1600_v12 }
 0x425   :  { %v3229_v33 = vpop.f32.mrf.mxu0 }
 0x426   :  { %v1803_v22 = vpop.f32.mrf.mxu1  ;;  %v1809_v17 = vadd.f32 %v3269_v40, %v3229_v33 }
 0x427   :  { %v1610_v37 = vpop.f32.mrf.mxu0 }
 0x428   :  { %v3272_v48 = vpop.f32.mrf.mxu1  ;;  %v1804_v20 = vadd.f32 %v1803_v22, %v1610_v37  ;;  %v5664_v22 = vld [vmem:[#allocation6_spill] sm:$0xff] }
 0x429   :  { %v3232_v29 = vpop.f32.mrf.mxu0 }
 0x42a   :  { %v4758_v50 = vpop.f32.mrf.mxu1  ;;  %v1819_v60 = vadd.f32 %v3272_v48, %v3232_v29  ;;  %v5679_v29 = vld [vmem:[#allocation12_spill] sm:$0xff] }
 0x42b   :  { %v4756_v23 = vpop.f32.mrf.mxu0  ;;  %v5680_v48 = vand.u32 7, %v5679_v29 }
 0x42c   :  { %v4762_v39 = vpop.f32.mrf.mxu1 }
 0x42d   :  { %v4760_v25 = vpop.f32.mrf.mxu0  ;;  %vm4869_vm4 = vcmp.le.s32.totalorder %v5680_v48, 4 }
 0x42e   :  { %v4766_v59 = vpop.f32.mrf.mxu1 }
 0x42f   :  { %v4764_v30 = vpop.f32.mrf.mxu0 }
 0x430   :  { %v4770_v44 = vpop.f32.mrf.mxu1 }
 0x431   :  { %v4768_v2 = vpop.f32.mrf.mxu0 }
 0x432   :  { %v4774_v27 = vpop.f32.mrf.mxu1 }
 0x433   :  { %v4772_v14 = vpop.f32.mrf.mxu0 }
 0x434   :  { %v4778_v6 = vpop.f32.mrf.mxu1 }
 0x435   :  { %v4776_v57 = vpop.f32.mrf.mxu0 }
 0x436   :  { %v4782_v21 = vpop.f32.mrf.mxu1 }
 0x437   :  { %v4780_v45 = vpop.f32.mrf.mxu0 }
 0x438   :  { %v4786_v16 = vpop.f32.mrf.mxu1 }
 0x439   :  { %v4784_v54 = vpop.f32.mrf.mxu0 }
 0x43a   :  { %v4790_v19 = vpop.f32.mrf.mxu1 }
 0x43b   :  { %v4788_v31 = vpop.f32.mrf.mxu0 }
 0x43c   :  { %v4794_v55 = vpop.f32.mrf.mxu1 }
 0x43d   :  { %v4792_v18 = vpop.f32.mrf.mxu0 }
 0x43e   :  { %v4798_v28 = vpop.f32.mrf.mxu1 }
 0x43f   :  { %v4796_v7 = vpop.f32.mrf.mxu0 }
 0x440   :  { %v3346_v38 = vpop.f32.mrf.mxu1 }
 0x441   :  { %v3306_v46 = vpop.f32.mrf.mxu0 }
 0x442   :  { %v2091_v26 = vadd.f32 %v3306_v46, %v1799_v52  ;;  %v2245_v24 = vpop.f32.mrf.mxu1  ;;  %v5665_v52 = vand.u32 7, %v5664_v22  ;;  %v1814_v22 = vadd.f32 %v4758_v50, %v4756_v23  ;;  %v1829_v23 = vadd.f32 %v4762_v39, %v4760_v25  ;;  %v5692_v46 = vld [vmem:[#allocation28_spill] sm:$0xff]  ;;  %v5697_v39 = vld [vmem:[#allocation29_spill] sm:$0xff] }
 0x443   :  { %v2011_v51 = vpop.f32.mrf.mxu0 }
 0x444   :  { %v2325_v8 = vadd.f32 %v3346_v38, %v2091_v26  ;;  %v2090_v41 = vadd.f32 %v2011_v51, %v1794_v62  ;;  %v3349_v35 = vpop.f32.mrf.mxu1  ;;  %vm4842_vm12 = vcmp.le.s32.totalorder %v5665_v52, 4  ;;  %v5668_v38 = vld [vmem:[#allocation15_spill] sm:$0xff] }
 0x445   :  { %v3309_v9 = vpop.f32.mrf.mxu0  ;;  %vm2368_vm6 = vcmp.le.s32.totalorder %v5668_v38, 4  ;;  %v5669_v62 = vld [vmem:[#allocation7_spill] sm:$0xff]  ;;  %vm4894_vm11 = vmand %vm2365_vm1, %vm4842_vm12 }
 0x446   :  { %v4824_v58 = vadd.f32 %v4803_v47, %v2325_v8  ;;  %v2324_v12 = vadd.f32 %v2245_v24, %v2090_v41  ;;  %v2093_v56 = vadd.f32 %v3309_v9, %v1809_v17  ;;  %v2255_v37 = vpop.f32.mrf.mxu1  ;;  %v5670_v26 = vand.u32 7, %v5669_v62  ;;  %v5674_v41 = vld [vmem:[#allocation11_spill] sm:$0xff] }
 0x447   :  { %v2021_v40 = vpop.f32.mrf.mxu0  ;;  %v5675_v49 = vand.u32 7, %v5674_v41 }
 0x448   :  { %vm4849_vm9 = vcmp.le.s32.totalorder %v5670_v26, 4  ;;  %v4855_v5 = vadd.f32 %v4803_v47, %v2324_v12  ;;  %v2327_v51 = vadd.f32 %v3349_v35, %v2093_v56  ;;  %v2092_v24 = vadd.f32 %v2021_v40, %v1804_v20  ;;  %v3352_v8 = vpop.f32.mrf.mxu1  ;;  %v5687_v26 = vld [vmem:[#allocation23_spill] sm:$0xff] }
 0x449   :  { %v2412_v4 = vsel %vm4830_vm13, %v4824_v58, 0.0  ;;  %v3312_v17 = vpop.f32.mrf.mxu0  ;;  %vm4862_vm15 = vcmp.le.s32.totalorder %v5675_v49, 4  ;;  %v1824_v49 = vadd.f32 %v4766_v59, %v4764_v30  ;;  %vm4935_vm12 = vmand %vm2368_vm6, %vm4849_vm9  ;;  %vm5724_vm9 = vcmp.le.s32.totalorder %v5697_v39, 4 }
 0x44a   :  { %v2411_v35 = vsel %vm4836_vm2, %v4855_v5, 0.0  ;;  %v4877_v20 = vadd.f32 %v4803_v47, %v2327_v51  ;;  %v2326_v56 = vadd.f32 %v2255_v37, %v2092_v24  ;;  %v2095_v40 = vadd.f32 %v3312_v17, %v1819_v60  ;;  %v2265_v61 = vpop.f32.mrf.mxu1  ;;  %v5688_v51 = vld [vmem:[#allocation13_spill] sm:$0xff]  ;;  %v5693_v24 = vld [vmem:[#allocation16_spill] sm:$0xff]  ;;  %vm4951_vm6 = vmand %vm2367_vm14, %vm4862_vm15 }
 0x44b   :  { %v2427_v52 = vsel %vm5438_vm5, %v2411_v35, 0.0  ;;  %v2031_v1 = vpop.f32.mrf.mxu0  ;;  %v5689_v37 = vand.u32 7, %v5688_v51  ;;  %v5694_v17 = vand.u32 7, %v5693_v24  ;;  %v2428_v29 = vsel %vm5438_vm5, %v2412_v4, 0.0  ;;  %vm4973_vm14 = vmand %vm2370_vm3, %vm4869_vm4 }
 0x44c   :  { %v4908_v50 = vadd.f32 %v4803_v47, %v2326_v56  ;;  %v2329_v53 = vadd.f32 %v3352_v8, %v2095_v40  ;;  %v2094_v48 = vadd.f32 %v2031_v1, %v1814_v22  ;;  %v3355_v25 = vpop.f32.mrf.mxu1  ;;  %v2429_v56 = vadd.f32 %v2428_v29, %v2427_v52  ;;  %v5700_v1 = vld [vmem:[#allocation17_spill] sm:$0xff] }
 0x44d   :  { %vm4901_vm10 = vcmp.le.s32.totalorder %v5689_v37, 4  ;;  %vm4913_vm1 = vcmp.le.s32.totalorder %v5694_v17, 4  ;;  %v3315_v35 = vpop.f32.mrf.mxu0  ;;  %v2414_v8 = vsel %vm4883_vm7, %v4877_v20, 0.0  ;;  %v5701_v24 = vand.u32 7, %v5700_v1  ;;  %v5706_v1 = vld [vmem:[#allocation35_spill] sm:$0xff] }
 0x44e   :  { %v2413_v40 = vsel %vm4894_vm11, %v4908_v50, 0.0  ;;  %v2097_v51 = vadd.f32 %v3315_v35, %v1829_v23  ;;  %v4929_v30 = vadd.f32 %v4803_v47, %v2329_v53  ;;  %v2328_v4 = vadd.f32 %v2265_v61, %v2094_v48  ;;  %v2275_v52 = vpop.f32.mrf.mxu1 }
 0x44f   :  { %v2430_v37 = vsel %vm5438_vm5, %v2413_v40, 0.0  ;;  %v2041_v22 = vpop.f32.mrf.mxu0  ;;  %vm4941_vm8 = vcmp.le.s32.totalorder %v5701_v24, 4  ;;  %v1839_v53 = vadd.f32 %v4770_v44, %v4768_v2  ;;  %v2432_v29 = vsel %vm5438_vm5, %v2414_v8, 0.0  ;;  %v5707_v2 = vld [vmem:[#allocation20_spill] sm:$0xff] }
 0x450   :  { %v2431_v17 = vadd.f32 %v2430_v37, %v2429_v56  ;;  %v2331_v63 = vadd.f32 %v3355_v25, %v2097_v51  ;;  %v2096_v61 = vadd.f32 %v2041_v22, %v1824_v49  ;;  %v4957_v48 = vadd.f32 %v4803_v47, %v2328_v4  ;;  %v3358_v40 = vpop.f32.mrf.mxu1 }
 0x451   :  { %v3318_v35 = vpop.f32.mrf.mxu0  ;;  %v5708_v44 = vand.u32 7, %v5707_v2  ;;  %v5711_v49 = vmov 0  ;;  %v1834_v51 = vadd.f32 %v4774_v27, %v4772_v14  ;;  %v2416_v37 = vsel %vm4935_vm12, %v4929_v30, 0.0 }
 0x452   :  { %v2433_v10 = vadd.f32 %v2432_v29, %v2431_v17  ;;  %v4967_v56 = vadd.f32 %v4803_v47, %v2331_v63  ;;  %v5712_v49 = vsel %vm4973_vm14, 4294967295, %v5711_v49  ;;  %v2330_v25 = vadd.f32 %v2275_v52, %v2096_v61  ;;  %v2285_v22 = vpop.f32.mrf.mxu1  ;;  %v5716_v52 = vld [vmem:[#allocation36_spill] sm:$0xff]  ;;  %v5717_v29 = vld [vmem:[#allocation21_spill] sm:$0xff] }
 0x453   :  { %vm4962_vm0 = vcmp.le.s32.totalorder %v5708_v44, 4  ;;  %v2099_v8 = vadd.f32 %v3318_v35, %v1839_v53  ;;  %v2415_v4 = vsel %vm4951_vm6, %v4957_v48, 0.0  ;;  %vm5713_vm15 = vcmp.le.s32.totalorder %v5687_v26, 4  ;;  %v2051_v3 = vpop.f32.mrf.mxu0 }
 0x454   :  { %vm4989_vm3 = vmand %vm5713_vm15, %vm4901_vm10  ;;  %v1849_v14 = vadd.f32 %v4778_v6, %v4776_v57  ;;  %v2434_v27 = vsel %vm5438_vm5, %v2415_v4, 0.0  ;;  %v4998_v24 = vadd.f32 %v4803_v47, %v2330_v25  ;;  %v1844_v26 = vadd.f32 %v4782_v21, %v4780_v45  ;;  %v3361_v61 = vpop.f32.mrf.mxu1 }
 0x455   :  { %v2333_v53 = vadd.f32 %v3358_v40, %v2099_v8  ;;  %v2435_v60 = vadd.f32 %v2434_v27, %v2433_v10  ;;  %v2098_v17 = vadd.f32 %v2051_v3, %v1834_v51  ;;  %v3321_v63 = vpop.f32.mrf.mxu0  ;;  %v5718_v35 = vand.u32 7, %v5717_v29 }
 0x456   :  { %v2436_v57 = vsel %vm5438_vm5, %v2416_v37, 0.0  ;;  %v2418_v6 = vsel %vm4973_vm14, %v4967_v56, 0.0  ;;  %v2417_v45 = vsel %vm4989_vm3, %v4998_v24, 0.0  ;;  %v2101_v21 = vadd.f32 %v3321_v63, %v1849_v14  ;;  %v2295_v37 = vpop.f32.mrf.mxu1 }
 0x457   :  { %vm5004_vm10 = vcmp.le.s32.totalorder %v5718_v35, 4  ;;  %v2437_v40 = vadd.f32 %v2436_v57, %v2435_v60  ;;  %v2438_v44 = vsel %vm5438_vm5, %v2417_v45, 0.0  ;;  %v5017_v10 = vadd.f32 %v4803_v47, %v2333_v53  ;;  %v2061_v51 = vpop.f32.mrf.mxu0  ;;  %vm5033_vm5 = vmand %vm5724_vm9, %vm4941_vm8 }
 0x458   :  { %vm5721_vm15 = vcmp.le.s32.totalorder %v5692_v46, 4  ;;  %v5722_v25 = vmov 0  ;;  %v2332_v8 = vadd.f32 %v2285_v22, %v2098_v17  ;;  %v1859_v4 = vadd.f32 %v4786_v16, %v4784_v54  ;;  %v3364_v53 = vpop.f32.mrf.mxu1 }
 0x459   :  { %vm5023_vm4 = vmand %vm5721_vm15, %vm4913_vm1  ;;  %v5725_v3 = vmov 0  ;;  %v2335_v41 = vadd.f32 %v3361_v61, %v2101_v21  ;;  %v2100_v46 = vadd.f32 %v2061_v51, %v1844_v26  ;;  %v2439_v14 = vadd.f32 %v2438_v44, %v2437_v40  ;;  %v3324_v27 = vpop.f32.mrf.mxu0  ;;  %v5737_v21 = vld [vmem:[#allocation32_spill] sm:$0xff] }
 0x45a   :  { %v5723_v25 = vsel %vm5023_vm4, 4294967295, %v5722_v25  ;;  %v5726_v3 = vsel %vm5033_vm5, 4294967295, %v5725_v3  ;;  %v5039_v22 = vadd.f32 %v4803_v47, %v2332_v8  ;;  %v5727_v54 = vand.u32 7, %v3833_v36  ;;  %v2305_v35 = vpop.f32.mrf.mxu1 }
 0x45b   :  { %vm5730_vm9 = vcmask 261120   ;;  %v5050_v23 = vadd.f32 %v4803_v47, %v2335_v41  ;;  %vm5731_vm1 = vcmp.le.s32.totalorder %v5706_v1, 4  ;;  %v5732_v26 = vmov 0  ;;  %v2071_v29 = vpop.f32.mrf.mxu0 }
 0x45c   :  { %vm5043_vm15 = vcmp.le.s32.totalorder %v5727_v54, 4  ;;  %v2440_v39 = vsel %vm5730_vm9, %v2418_v6, 0.0  ;;  %vm5056_vm14 = vmand %vm5731_vm1, %vm4962_vm0  ;;  %v2334_v36 = vadd.f32 %v2295_v37, %v2100_v46  ;;  %v2103_v60 = vadd.f32 %v3324_v27, %v1859_v4  ;;  %v3367_v8 = vpop.f32.mrf.mxu1 }
 0x45d   :  { %v5733_v26 = vsel %vm5056_vm14, 4294967295, %v5732_v26  ;;  %v1854_v17 = vadd.f32 %v4790_v19, %v4788_v31  ;;  %v2420_v63 = vsel %vm5023_vm4, %v5017_v10, 0.0  ;;  %v2419_v61 = vsel %vm5033_vm5, %v5039_v22, 0.0  ;;  %v3327_v44 = vpop.f32.mrf.mxu0 }
 0x45e   :  { %v2441_v9 = vadd.f32 %v2440_v39, %v2439_v14  ;;  %vm5734_vm0 = vcmp.le.s32.totalorder %v5716_v52, 4  ;;  %v5735_v1 = vmov 0  ;;  %v1869_v31 = vadd.f32 %v4794_v55, %v4792_v18 }
 0x45f   :  { %vm5072_vm1 = vmand %vm5734_vm0, %vm5004_vm10  ;;  %v2442_v19 = vsel %vm5730_vm9, %v2419_v61, 0.0  ;;  %v5080_v57 = vadd.f32 %v4803_v47, %v2334_v36  ;;  %v2337_v6 = vadd.f32 %v3364_v53, %v2103_v60  ;;  %v1864_v2 = vadd.f32 %v4798_v28, %v4796_v7  ;;  %v2081_v14 = vpop.f32.mrf.mxu0  ;;  %v5748_v36 = vld [vmem:[#allocation39_spill] sm:$0xff] }
 0x460   :  { %v5736_v1 = vsel %vm5072_vm1, 4294967295, %v5735_v1  ;;  %v2443_v45 = vadd.f32 %v2442_v19, %v2441_v9  ;;  %v2102_v52 = vadd.f32 %v2071_v29, %v1854_v17  ;;  %v5738_v40 = vand.u32 7, %v5737_v21  ;;  %vm5739_vm0 = vmmov %vm5730_vm9 }
 0x461   :  { %v2444_v51 = vsel %vm5739_vm0, %v2420_v63, 0.0  ;;  %v2422_v18 = vsel %vm5056_vm14, %v5050_v23, 0.0  ;;  %v2421_v55 = vsel %vm5072_vm1, %v5080_v57, 0.0  ;;  %v2105_v37 = vadd.f32 %v3327_v44, %v1869_v31  ;;  %vm5740_vm9 = vmmov %vm5739_vm0 }
 0x462   :  { %vm2391_vm10 = vcmp.le.s32.totalorder %v5738_v40, 4  ;;  %v2445_v4 = vadd.f32 %v2444_v51, %v2443_v45  ;;  %v2446_v7 = vsel %vm5740_vm9, %v2421_v55, 0.0  ;;  %v5095_v28 = vadd.f32 %v4803_v47, %v2337_v6 }
 0x463   :  { %vm5741_vm8 = vcmp.le.s32.totalorder %v3909_v0, 4  ;;  %v5742_v41 = vmov 0  ;;  %v2336_v46 = vadd.f32 %v2305_v35, %v2102_v52  ;;  %vm5744_vm14 = vcmp.le.s32.totalorder %v3950_v13, 4  ;;  %v2315_v13 = vpop.f32.mrf.mxu1  ;;  %v2553_v35 = vld [vmem:[%s5381_s7] sm:$0x1] }
 0x464   :  { %vm5101_vm0 = vmand %vm5741_vm8, %vm5043_vm15  ;;  %v2339_v53 = vadd.f32 %v3367_v8, %v2105_v37  ;;  %v2104_v54 = vadd.f32 %v2081_v14, %v1864_v2  ;;  %vm2377_vm9 = vcmp.le.s32.totalorder %v4102_v15, 4  ;;  %v5747_v16 = vand.u32 7, %v4003_v32 }
 0x465   :  { %v5743_v41 = vsel %vm5101_vm0, 4294967295, %v5742_v41  ;;  %vm5107_vm1 = vmand %vm5744_vm14, %vm2391_vm10  ;;  %v2447_v0 = vadd.f32 %v2446_v7, %v2445_v4  ;;  %v5115_v39 = vadd.f32 %v4803_v47, %v2336_v46  ;;  %vm2378_vm15 = vcmp.le.s32.totalorder %v4062_v11, 4 }
 0x466   :  { %vm2393_vm4 = vcmp.le.s32.totalorder %v5747_v16, 4  ;;  %v5749_v60 = vand.u32 7, %v5748_v36  ;;  %vm5750_vm14 = vcmask 261120   ;;  %v2338_v63 = vadd.f32 %v2315_v13, %v2104_v54 }
 0x467   :  { %v2448_v17 = vsel %vm5750_vm14, %v2422_v18, 0.0  ;;  %v2424_v15 = vsel %vm5101_vm0, %v5095_v28, 0.0  ;;  %v2423_v32 = vsel %vm5107_vm1, %v5115_v39, 0.0  ;;  %v5128_v9 = vadd.f32 %v4803_v47, %v2339_v53  ;;  %vm5130_vm10 = vmand %vm2377_vm9, %vm2393_vm4 }
 0x468   :  { %vm2394_vm8 = vcmp.le.s32.totalorder %v5749_v60, 4  ;;  %v2449_v61 = vadd.f32 %v2448_v17, %v2447_v0  ;;  %vm5753_vm5 = vmmov %vm5750_vm14  ;;  %v5140_v31 = vadd.f32 %v4803_v47, %v2338_v63 }
 0x469   :  { %v2450_v29 = vsel %vm5753_vm5, %v2423_v32, 0.0  ;;  %vm5135_vm14 = vmand %vm2378_vm15, %vm2394_vm8  ;;  %vm5768_vm8 = vnez %v5723_v25 }
 0x46a   :  { %v2451_v19 = vadd.f32 %v2450_v29, %v2449_v61  ;;  %vm5756_vm0 = vmmov %vm5753_vm5  ;;  %v2425_v2 = vsel %vm5130_vm10, %v5140_v31, 0.0  ;;  %v2426_v45 = vsel %vm5135_vm14, %v5128_v9, 0.0 }
 0x46b   :  { %v2452_v6 = vsel %vm5756_vm0, %v2424_v15, 0.0  ;;  %vm5757_vm5 = vmmov %vm5756_vm0 }
 0x46c   :  { %v2453_v52 = vadd.f32 %v2452_v6, %v2451_v19  ;;  %v2454_v21 = vsel %vm5757_vm5, %v2425_v2, 0.0  ;;  %vm5758_vm4 = vmmov %vm5756_vm0 }
 0x46d   :  { %v2456_v44 = vsel %vm5758_vm4, %v2426_v45, 0.0  ;;  %vm5759_vm9 = vmmov %vm5756_vm0  ;;  %vm5770_vm4 = vnez %v5736_v1 }
 0x46e   :  { %v2455_v40 = vadd.f32 %v2454_v21, %v2453_v52  ;;  %vm5767_vm15 = vmmov %vm5756_vm0 }
 0x46f   :  { %vm5769_vm5 = vmmov %vm5756_vm0 }
 0x470   :  { %v2457_v8 = vadd.f32 %v2456_v44, %v2455_v40 }
 0x472   :  { %v2458_v47 = vrot.slane %v2457_v8, 4 }
 0x474   :  { %v2459_v51 = vadd.f32 %v2458_v47, %v2457_v8 }
 0x476   :  { %v2460_v18 = vrot.slane %v2459_v51, 2 }
 0x478   :  { %v2461_v55 = vadd.f32 %v2460_v18, %v2459_v51 }
 0x47a   :  { %v2462_v37 = vrot.slane %v2461_v55, 1 }
 0x47c   :  { %v2463_v4 = vadd.f32 %v2462_v37, %v2461_v55 }
 0x47e   :  { %v2464_v7 = vmul.f32 0.02, %v2463_v4 }
 0x480   :  { %v5152_v46 = vsub.f32 %v4855_v5, %v2464_v7  ;;  %v5155_v14 = vsub.f32 %v4824_v58, %v2464_v7  ;;  %v5158_v53 = vsub.f32 %v4908_v50, %v2464_v7  ;;  %v5161_v54 = vsub.f32 %v4877_v20, %v2464_v7 }
 0x481   :  { %v5168_v36 = vsub.f32 %v4957_v48, %v2464_v7  ;;  %v5173_v58 = vsub.f32 %v4929_v30, %v2464_v7  ;;  %v5182_v13 = vsub.f32 %v4998_v24, %v2464_v7  ;;  %v5191_v15 = vsub.f32 %v4967_v56, %v2464_v7 }
 0x482   :  { %v2481_v16 = vmul.f32 %v5152_v46, %v5152_v46  ;;  %v2482_v0 = vmul.f32 %v5155_v14, %v5155_v14  ;;  %v2483_v5 = vmul.f32 %v5158_v53, %v5158_v53  ;;  %v2484_v50 = vmul.f32 %v5161_v54, %v5161_v54 }
 0x483   :  { %v2485_v48 = vmul.f32 %v5168_v36, %v5168_v36  ;;  %v2486_v43 = vmul.f32 %v5173_v58, %v5173_v58  ;;  %v5199_v61 = vsub.f32 %v5039_v22, %v2464_v7  ;;  %v2487_v62 = vmul.f32 %v5182_v13, %v5182_v13 }
 0x484   :  { %v2497_v20 = vsel %vm4836_vm2, %v2481_v16, 0.0  ;;  %v2498_v60 = vsel %vm4830_vm13, %v2482_v0, 0.0  ;;  %v2499_v17 = vsel %vm4894_vm11, %v2483_v5, 0.0  ;;  %v2500_v33 = vsel %vm4883_vm7, %v2484_v50, 0.0  ;;  %vm5760_vm13 = vmmov %vm5756_vm0 }
 0x485   :  { %v2513_v30 = vsel %vm5756_vm0, %v2497_v20, 0.0  ;;  %v2514_v63 = vsel %vm5759_vm9, %v2498_v60, 0.0  ;;  %v2516_v32 = vsel %vm5760_vm13, %v2499_v17, 0.0  ;;  %v2501_v29 = vsel %vm4951_vm6, %v2485_v48, 0.0  ;;  %vm5761_vm2 = vmmov %vm5756_vm0 }
 0x486   :  { %v2515_v24 = vadd.f32 %v2514_v63, %v2513_v30  ;;  %v2518_v19 = vsel %vm5761_vm2, %v2500_v33, 0.0  ;;  %v5207_v6 = vsub.f32 %v5017_v10, %v2464_v7  ;;  %v2488_v12 = vmul.f32 %v5191_v15, %v5191_v15  ;;  %vm5762_vm7 = vmmov %vm5756_vm0 }
 0x487   :  { %v2502_v2 = vsel %vm4935_vm12, %v2486_v43, 0.0  ;;  %v2520_v45 = vsel %vm5762_vm7, %v2501_v29, 0.0  ;;  %v5215_v52 = vsub.f32 %v5080_v57, %v2464_v7  ;;  %v2489_v38 = vmul.f32 %v5199_v61, %v5199_v61  ;;  %vm5763_vm11 = vmmov %vm5756_vm0 }
 0x488   :  { %v2517_v56 = vadd.f32 %v2516_v32, %v2515_v24  ;;  %v2503_v21 = vsel %vm4989_vm3, %v2487_v62, 0.0  ;;  %v2522_v40 = vsel %vm5763_vm11, %v2502_v2, 0.0  ;;  %v5223_v44 = vsub.f32 %v5050_v23, %v2464_v7  ;;  %vm5765_vm6 = vmmov %vm5756_vm0 }
 0x489   :  { %v2490_v59 = vmul.f32 %v5207_v6, %v5207_v6  ;;  %vm5764_vm12 = vnez %v5712_v49  ;;  %v2524_v47 = vsel %vm5765_vm6, %v2503_v21, 0.0  ;;  %v2477_v51 = vsub.f32 %v5115_v39, %v2464_v7  ;;  %vm5772_vm13 = vmmov %vm5756_vm0 }
 0x48a   :  { %v2519_v22 = vadd.f32 %v2518_v19, %v2517_v56  ;;  %v2504_v8 = vsel %vm5764_vm12, %v2488_v12, 0.0  ;;  %v2491_v42 = vmul.f32 %v5215_v52, %v5215_v52  ;;  %vm5766_vm3 = vnez %v5726_v3  ;;  %vm5773_vm2 = vmmov %vm5756_vm0 }
 0x48b   :  { %v2505_v18 = vsel %vm5766_vm3, %v2489_v38, 0.0  ;;  %v2526_v23 = vsel %vm5767_vm15, %v2504_v8, 0.0  ;;  %v5237_v37 = vsub.f32 %v5095_v28, %v2464_v7  ;;  %v2492_v49 = vmul.f32 %v5223_v44, %v5223_v44  ;;  %vm5775_vm11 = vmmov %vm5756_vm0 }
 0x48c   :  { %v2521_v10 = vadd.f32 %v2520_v45, %v2519_v22  ;;  %v2506_v4 = vsel %vm5768_vm8, %v2490_v59, 0.0  ;;  %v2528_v39 = vsel %vm5769_vm5, %v2505_v18, 0.0  ;;  %v2479_v0 = vsub.f32 %v5140_v31, %v2464_v7  ;;  %vm5776_vm12 = vmmov %vm5756_vm0 }
 0x48d   :  { %v2493_v5 = vmul.f32 %v2477_v51, %v2477_v51  ;;  %v2507_v3 = vsel %vm5770_vm4, %v2491_v42, 0.0  ;;  %v2530_v20 = vsel %vm5756_vm0, %v2506_v4, 0.0  ;;  %v5249_v28 = vsub.f32 %v5128_v9, %v2464_v7  ;;  %vm5778_vm6 = vmmov %vm5756_vm0 }
 0x48e   :  { %v2523_v57 = vadd.f32 %v2522_v40, %v2521_v10  ;;  %v2494_v60 = vmul.f32 %v5237_v37, %v5237_v37  ;;  %vm5771_vm9 = vnez %v5733_v26  ;;  %v2532_v17 = vsel %vm5772_vm13, %v2507_v3, 0.0  ;;  %vm5779_vm4 = vmmov %vm5756_vm0 }
 0x48f   :  { %v2508_v25 = vsel %vm5771_vm9, %v2492_v49, 0.0  ;;  %v2495_v31 = vmul.f32 %v2479_v0, %v2479_v0  ;;  %v2509_v1 = vsel %vm5107_vm1, %v2493_v5, 0.0  ;;  %v2496_v9 = vmul.f32 %v5249_v28, %v5249_v28  ;;  %vm5777_vm1 = vmmov %vm5756_vm0 }
 0x490   :  { %v2525_v55 = vadd.f32 %v2524_v47, %v2523_v57  ;;  %v2534_v63 = vsel %vm5773_vm2, %v2508_v25, 0.0  ;;  %vm5774_vm7 = vnez %v5743_v41  ;;  %v2536_v26 = vsel %vm5775_vm11, %v2509_v1, 0.0  ;;  %v5280_v57 = vld [vmem:[%s5382_s8] ss:$0 sm:$0xff]  ;;  %vm5780_vm13 = vmmov %vm5756_vm0 }
 0x491   :  { %v2510_v7 = vsel %vm5774_vm7, %v2494_v60, 0.0  ;;  %v2511_v33 = vsel %vm5130_vm10, %v2495_v31, 0.0  ;;  %v2512_v27 = vsel %vm5135_vm14, %v2496_v9, 0.0  ;;  %vm5781_vm2 = vmmov %vm5756_vm0 }
 0x492   :  { %v2527_v16 = vadd.f32 %v2526_v23, %v2525_v55  ;;  %v2538_v32 = vsel %vm5776_vm12, %v2510_v7, 0.0  ;;  %v2540_v29 = vsel %vm5777_vm1, %v2511_v33, 0.0  ;;  %v2542_v19 = vsel %vm5778_vm6, %v2512_v27, 0.0  ;;  %vm5782_vm11 = vmmov %vm5756_vm0 }
 0x493   :  { %vm5783_vm6 = vmmov %vm5756_vm0 }
 0x494   :  { %v2529_v50 = vadd.f32 %v2528_v39, %v2527_v16 }
 0x496   :  { %v2531_v48 = vadd.f32 %v2530_v20, %v2529_v50 }
 0x498   :  { %v2533_v30 = vadd.f32 %v2532_v17, %v2531_v48 }
 0x49a   :  { %v2535_v43 = vadd.f32 %v2534_v63, %v2533_v30  ;;  %v2649_v63 = vld [vmem:[%s5383_s9 + $0x18] sm:$0xff] }
 0x49c   :  { %v2537_v24 = vadd.f32 %v2536_v26, %v2535_v43 }
 0x49e   :  { %v2539_v62 = vadd.f32 %v2538_v32, %v2537_v24 }
 0x4a0   :  { %v2541_v56 = vadd.f32 %v2540_v29, %v2539_v62 }
 0x4a2   :  { %v2543_v41 = vadd.f32 %v2542_v19, %v2541_v56 }
 0x4a4   :  { %v2544_v12 = vrot.slane %v2543_v41, 4 }
 0x4a6   :  { %v2545_v2 = vadd.f32 %v2544_v12, %v2543_v41 }
 0x4a8   :  { %v2546_v22 = vrot.slane %v2545_v2, 2 }
 0x4aa   :  { %v2547_v45 = vadd.f32 %v2546_v22, %v2545_v2  ;;  %v2650_v2 = vld [vmem:[%s5383_s9 + $0x20] sm:$0xff] }
 0x4ac   :  { %v2548_v38 = vrot.slane %v2547_v45, 1 }
 0x4ae   :  { %v2549_v11 = vadd.f32 %v2548_v38, %v2547_v45 }
 0x4b0   :  { %v2550_v21 = vmul.f32 0.02, %v2549_v11 }
 0x4b2   :  { %v2551_v10 = vadd.f32 1e-05, %v2550_v21 }
 0x4b4   :  { %3377 = vrsqrt.f32 %v2551_v10 }
 0x4c1   :  { %v3378_v40 = vpop.eup %3377 }
 0x4c2   :  { %v2554_v59 = vmul.f32 %v3378_v40, %v2553_v35 }
 0x4c4   :  { %v5275_v8 = vrot.slane %v2554_v59, %v4289_v34 }
 0x4c6   :  { %v2573_v47 = vmul.f32 %v5275_v8, %v2479_v0  ;;  %v2568_v42 = vmul.f32 %v5275_v8, %v5207_v6  ;;  %v2567_v18 = vmul.f32 %v5275_v8, %v5199_v61  ;;  %v2569_v55 = vmul.f32 %v5275_v8, %v5215_v52 }
 0x4c7   :  { %v2559_v34 = vmul.f32 %v5275_v8, %v5152_v46  ;;  %v2570_v23 = vmul.f32 %v5275_v8, %v5223_v44  ;;  %v2560_v49 = vmul.f32 %v5275_v8, %v5155_v14  ;;  %v2571_v4 = vmul.f32 %v5275_v8, %v2477_v51  ;;  %v2647_v46 = vld [vmem:[%s5383_s9 + $0x8] sm:$0xff]  ;;  %v2646_v44 = vld [vmem:[%s5383_s9] sm:$0xff]  ;;  %v2648_v14 = vld [vmem:[%s5383_s9 + $0x10] sm:$0xff] }
 0x4c8   :  { %v2591_v16 = vadd.f32 %v5280_v57, %v2568_v42  ;;  %v2590_v6 = vadd.f32 %v5280_v57, %v2567_v18  ;;  %v2592_v61 = vadd.f32 %v5280_v57, %v2569_v55  ;;  %v2561_v52 = vmul.f32 %v5275_v8, %v5158_v53 }
 0x4c9   :  { %v2582_v51 = vadd.f32 %v5280_v57, %v2559_v34  ;;  %v2593_v39 = vadd.f32 %v5280_v57, %v2570_v23  ;;  %v2583_v0 = vadd.f32 %v5280_v57, %v2560_v49  ;;  %v2594_v53 = vadd.f32 %v5280_v57, %v2571_v4  ;;  %v2651_v49 = vld [vmem:[%s5383_s9 + $0x28] sm:$0xff] }
 0x4ca   :  { %vm2607_vm10 = vcmp.gt.f32.partialorder %v2591_v16, 0.0  ;;  %v2623_v5 = vmul.f32 0.2, %v2591_v16  ;;  %vm2606_vm14 = vcmp.gt.f32.partialorder %v2590_v6, 0.0  ;;  %v2622_v3 = vmul.f32 0.2, %v2590_v6 }
 0x4cb   :  { %vm2608_vm3 = vcmp.gt.f32.partialorder %v2592_v61, 0.0  ;;  %v2624_v50 = vmul.f32 0.2, %v2592_v61  ;;  %vm2598_vm15 = vcmp.gt.f32.partialorder %v2582_v51, 0.0  ;;  %v2614_v20 = vmul.f32 0.2, %v2582_v51 }
 0x4cc   :  { %v2639_v60 = vsel %vm2607_vm10, %v2591_v16, %v2623_v5  ;;  %v2638_v25 = vsel %vm2606_vm14, %v2590_v6, %v2622_v3  ;;  %vm2609_vm8 = vcmp.gt.f32.partialorder %v2593_v39, 0.0  ;;  %v2625_v48 = vmul.f32 0.2, %v2593_v39  ;;  %vm5784_vm14 = vmmov %vm5756_vm0 }
 0x4cd   :  { %v2663_v17 = vmul.f32 %v2647_v46, %v2639_v60  ;;  %v2662_v31 = vmul.f32 %v2646_v44, %v2638_v25  ;;  %v2640_v1 = vsel %vm2608_vm3, %v2592_v61, %v2624_v50  ;;  %v2630_v30 = vsel %vm2598_vm15, %v2582_v51, %v2614_v20  ;;  %vm5785_vm3 = vmmov %vm5756_vm0 }
 0x4ce   :  { %v2664_v9 = vmul.f32 %v2648_v14, %v2640_v1  ;;  %v2654_v7 = vmul.f32 %v2646_v44, %v2630_v30  ;;  %v2641_v43 = vsel %vm2609_vm8, %v2593_v39, %v2625_v48  ;;  %vm2599_vm5 = vcmp.gt.f32.partialorder %v2583_v0, 0.0 }
 0x4cf   :  { %v2697_v26 = vsel %vm5779_vm4, %v2663_v17, 0.0  ;;  %v2694_v33 = vsel %vm5756_vm0, %v2662_v31, 0.0  ;;  %v2615_v24 = vmul.f32 0.2, %v2583_v0  ;;  %v2665_v32 = vmul.f32 %v2649_v63, %v2641_v43  ;;  %vm5786_vm4 = vmmov %vm5756_vm0  ;;  %v2653_v17 = vld [vmem:[%s5383_s9 + $0x38] sm:$0xff] }
 0x4d0   :  { %2698 = vadd.xlane.f32.xlu1 %v2697_v26  ;;  %2695 = vadd.xlane.f32.xlu0 %v2694_v33  ;;  %vm2610_vm9 = vcmp.gt.f32.partialorder %v2594_v53, 0.0  ;;  %v2626_v27 = vmul.f32 0.2, %v2594_v53  ;;  %v2700_v62 = vsel %vm5780_vm13, %v2664_v9, 0.0  ;;  %v2584_v56 = vadd.f32 %v5280_v57, %v2561_v52  ;;  %vm5787_vm13 = vmmov %vm5756_vm0 }
 0x4d1   :  { %v2631_v29 = vsel %vm2599_vm5, %v2583_v0, %v2615_v24  ;;  %v2572_v19 = vmul.f32 %v5275_v8, %v5237_v37  ;;  %v2670_v41 = vsel %vm5781_vm2, %v2654_v7, 0.0  ;;  %v2562_v22 = vmul.f32 %v5275_v8, %v5161_v54  ;;  %vm5788_vm2 = vmmov %vm5756_vm0 }
 0x4d2   :  { %v2642_v12 = vsel %vm2610_vm9, %v2594_v53, %v2626_v27  ;;  %v2596_v45 = vadd.f32 %v5280_v57, %v2573_v47  ;;  %v2655_v38 = vmul.f32 %v2647_v46, %v2631_v29  ;;  %vm2600_vm7 = vcmp.gt.f32.partialorder %v2584_v56, 0.0 }
 0x4d3   :  { %v2616_v11 = vmul.f32 0.2, %v2584_v56  ;;  %v2595_v21 = vadd.f32 %v5280_v57, %v2572_v19  ;;  %v2703_v37 = vsel %vm5782_vm11, %v2665_v32, 0.0  ;;  %v2585_v10 = vadd.f32 %v5280_v57, %v2562_v22  ;;  %vm5789_vm11 = vmmov %vm5756_vm0 }
 0x4d4   :  { %2701 = vadd.xlane.f32.xlu1 %v2700_v62  ;;  %2671 = vadd.xlane.f32.xlu0 %v2670_v41  ;;  %v2666_v35 = vmul.f32 %v2650_v2, %v2642_v12  ;;  %v2628_v18 = vmul.f32 0.2, %v2596_v45  ;;  %v2673_v47 = vsel %vm5783_vm6, %v2655_v38, 0.0  ;;  %vm2612_vm10 = vcmp.gt.f32.partialorder %v2596_v45, 0.0  ;;  %vm5792_vm6 = vmmov %vm5756_vm0 }
 0x4d5   :  { %v2632_v40 = vsel %vm2600_vm7, %v2584_v56, %v2616_v11  ;;  %vm2611_vm12 = vcmp.gt.f32.partialorder %v2595_v21, 0.0  ;;  %v2627_v59 = vmul.f32 0.2, %v2595_v21  ;;  %vm2601_vm1 = vcmp.gt.f32.partialorder %v2585_v10, 0.0 }
 0x4d6   :  { %v2656_v42 = vmul.f32 %v2648_v14, %v2632_v40  ;;  %v2617_v54 = vmul.f32 0.2, %v2585_v10  ;;  %v2563_v55 = vmul.f32 %v5275_v8, %v5168_v36  ;;  %v2574_v34 = vmul.f32 %v5275_v8, %v5249_v28 }
 0x4d7   :  { %v2643_v23 = vsel %vm2611_vm12, %v2595_v21, %v2627_v59  ;;  %v2564_v16 = vmul.f32 %v5275_v8, %v5173_v58  ;;  %v2706_v6 = vsel %vm5784_vm14, %v2666_v35, 0.0  ;;  %v2644_v28 = vsel %vm2612_vm10, %v2596_v45, %v2628_v18  ;;  %v2652_v58 = vld [vmem:[%s5383_s9 + $0x30] sm:$0xff]  ;;  %vm5790_vm12 = vmmov %vm5756_vm0 }
 0x4d8   :  { %2704 = vadd.xlane.f32.xlu1 %v2703_v37  ;;  %2674 = vadd.xlane.f32.xlu0 %v2673_v47  ;;  %v2633_v4 = vsel %vm2601_vm1, %v2585_v10, %v2617_v54  ;;  %v2586_v61 = vadd.f32 %v5280_v57, %v2563_v55  ;;  %v2597_v36 = vadd.f32 %v5280_v57, %v2574_v34  ;;  %v2676_v52 = vsel %vm5785_vm3, %v2656_v42, 0.0  ;;  %vm5791_vm1 = vmmov %vm5756_vm0 }
 0x4d9   :  { %v2587_v46 = vadd.f32 %v5280_v57, %v2564_v16  ;;  %v2565_v44 = vmul.f32 %v5275_v8, %v5182_v13  ;;  %v2667_v14 = vmul.f32 %v2651_v49, %v2643_v23  ;;  %v2657_v51 = vmul.f32 %v2649_v63, %v2633_v4 }
 0x4da   :  { %vm2602_vm15 = vcmp.gt.f32.partialorder %v2586_v61, 0.0  ;;  %v2618_v39 = vmul.f32 0.2, %v2586_v61  ;;  %v2629_v0 = vmul.f32 0.2, %v2597_v36  ;;  %v2566_v3 = vmul.f32 %v5275_v8, %v5191_v15 }
 0x4db   :  { %v2619_v53 = vmul.f32 0.2, %v2587_v46  ;;  %v2588_v5 = vadd.f32 %v5280_v57, %v2565_v44  ;;  %vm2613_vm8 = vcmp.gt.f32.partialorder %v2597_v36, 0.0  ;;  %vm2603_vm5 = vcmp.gt.f32.partialorder %v2587_v46, 0.0 }
 0x4dc   :  { %2707 = vadd.xlane.f32.xlu1 %v2706_v6  ;;  %2677 = vadd.xlane.f32.xlu0 %v2676_v52  ;;  %v2634_v50 = vsel %vm2602_vm15, %v2586_v61, %v2618_v39  ;;  %v2709_v13 = vsel %vm5786_vm4, %v2667_v14, 0.0  ;;  %v2679_v20 = vsel %vm5756_vm0, %v2657_v51, 0.0  ;;  %v2668_v60 = vmul.f32 %v2652_v58, %v2644_v28 }
 0x4dd   :  { %v2658_v25 = vmul.f32 %v2650_v2, %v2634_v50  ;;  %v2645_v48 = vsel %vm2613_vm8, %v2597_v36, %v2629_v0  ;;  %v2635_v31 = vsel %vm2603_vm5, %v2587_v46, %v2619_v53  ;;  %v2620_v1 = vmul.f32 0.2, %v2588_v5 }
 0x4de   :  { %v2589_v15 = vadd.f32 %v5280_v57, %v2566_v3  ;;  %vm2604_vm9 = vcmp.gt.f32.partialorder %v2588_v5, 0.0  ;;  %v2712_v8 = vsel %vm5787_vm13, %v2668_v60, 0.0  ;;  %v2669_v63 = vmul.f32 %v2653_v17, %v2645_v48 }
 0x4df   :  { %v2682_v30 = vsel %vm5788_vm2, %v2658_v25, 0.0  ;;  %v2659_v9 = vmul.f32 %v2651_v49, %v2635_v31  ;;  %v2636_v7 = vsel %vm2604_vm9, %v2588_v5, %v2620_v1  ;;  %v16_v29 = vstv %s5384_s10 }
 0x4e0   :  { %2710 = vadd.xlane.f32.xlu1 %v2709_v13  ;;  %2680 = vadd.xlane.f32.xlu0 %v2679_v20  ;;  %v2621_v43 = vmul.f32 0.2, %v2589_v15  ;;  %vm2605_vm7 = vcmp.gt.f32.partialorder %v2589_v15, 0.0  ;;  %v2715_v26 = vsel %vm5789_vm11, %v2669_v63, 0.0  ;;  %v2660_v24 = vmul.f32 %v2652_v58, %v2636_v7  ;;  %17 = vst [vmem:[#allocation3] sm:$0x1] %v16_v29 }
 0x4e1   :  { %v2685_v33 = vsel %vm5790_vm12, %v2659_v9, 0.0  ;;  %vm2756_vm10 = vcmask 1041409   ;;  %vm2759_vm14 = vcmask 1024  }
 0x4e2   :  { %v2637_v57 = vsel %vm2605_vm7, %v2589_v15, %v2621_v43  ;;  %v2688_v32 = vsel %vm5791_vm1, %v2660_v24, 0.0 }
 0x4e3   :  { %v2661_v27 = vmul.f32 %v2653_v17, %v2637_v57 }
 0x4e4   :  { %2713 = vadd.xlane.f32.xlu1 %v2712_v8  ;;  %2683 = vadd.xlane.f32.xlu0 %v2682_v30 }
 0x4e5   :  { %v2691_v62 = vsel %vm5792_vm6, %v2661_v27, 0.0 }
 0x4e7   :  { %v2927_v3 = vld [vmem:[#allocation3] ss:$0 sm:$0xff] }
 0x4e8   :  { %2716 = vadd.xlane.f32.xlu1 %v2715_v26  ;;  %2686 = vadd.xlane.f32.xlu0 %v2685_v33 }
 0x4ec   :  { %2689 = vadd.xlane.f32.xlu0 %v2688_v32 }
 0x4f0   :  { %2692 = vadd.xlane.f32.xlu0 %v2691_v62 }
 0x559   :  { %v2699_v56 = vpop.xlane.xlu1 %2698  ;;  %v2696_v19 = vpop.xlane.xlu0 %2695 }
 0x55a   :  { %v2731_v11 = vadd.f32 %v2699_v56, %v2696_v19 }
 0x55d   :  { %v2702_v41 = vpop.xlane.xlu1 %2701  ;;  %v2672_v12 = vpop.xlane.xlu0 %2671 }
 0x55e   :  { %v2732_v21 = vadd.f32 %v2731_v11, %v2702_v41 }
 0x561   :  { %v2705_v2 = vpop.xlane.xlu1 %2704  ;;  %v2675_v22 = vpop.xlane.xlu0 %2674 }
 0x562   :  { %v2733_v35 = vadd.f32 %v2732_v21, %v2705_v2  ;;  %v2718_v54 = vadd.f32 %v2675_v22, %v2672_v12 }
 0x565   :  { %v2708_v45 = vpop.xlane.xlu1 %2707  ;;  %v2678_v38 = vpop.xlane.xlu0 %2677 }
 0x566   :  { %v2734_v40 = vadd.f32 %v2733_v35, %v2708_v45  ;;  %v2719_v47 = vadd.f32 %v2718_v54, %v2678_v38 }
 0x569   :  { %v2711_v37 = vpop.xlane.xlu1 %2710  ;;  %v2681_v10 = vpop.xlane.xlu0 %2680 }
 0x56a   :  { %v2735_v18 = vadd.f32 %v2734_v40, %v2711_v37  ;;  %v2720_v49 = vadd.f32 %v2719_v47, %v2681_v10 }
 0x56d   :  { %v2714_v59 = vpop.xlane.xlu1 %2713  ;;  %v2684_v42 = vpop.xlane.xlu0 %2683 }
 0x56e   :  { %v2736_v55 = vadd.f32 %v2735_v18, %v2714_v59  ;;  %v2721_v16 = vadd.f32 %v2720_v49, %v2684_v42 }
 0x571   :  { %v2717_v34 = vpop.xlane.xlu1 %2716  ;;  %v2687_v23 = vpop.xlane.xlu0 %2686 }
 0x572   :  { %v2737_v4 = vadd.f32 %v2736_v55, %v2717_v34  ;;  %v2722_v52 = vadd.f32 %v2721_v16, %v2687_v23 }
 0x574   :  { %v2738_v6 = vrot.slane %v2737_v4, 4 }
 0x575   :  { %v2690_v61 = vpop.xlane.xlu0 %2689 }
 0x576   :  { %v2739_v36 = vadd.f32 %v2738_v6, %v2737_v4  ;;  %v2723_v46 = vadd.f32 %v2722_v52, %v2690_v61 }
 0x578   :  { %v2740_v28 = vrot.slane %v2739_v36, 2 }
 0x579   :  { %v2693_v44 = vpop.xlane.xlu0 %2692 }
 0x57a   :  { %v2741_v14 = vadd.f32 %v2740_v28, %v2739_v36  ;;  %v2724_v51 = vadd.f32 %v2723_v46, %v2693_v44 }
 0x57c   :  { %v2742_v39 = vrot.slane %v2741_v14, 1  ;;  %v2725_v58 = vrot.slane %v2724_v51, 4 }
 0x57e   :  { %v2726_v0 = vadd.f32 %v2725_v58, %v2724_v51  ;;  %v2743_v53 = vadd.f32 %v2742_v39, %v2741_v14 }
 0x580   :  { %v2727_v5 = vrot.slane %v2726_v0, 2  ;;  %v2752_v13 = vadd.f32 %v2927_v3, %v2743_v53 }
 0x582   :  { %v2728_v50 = vadd.f32 %v2727_v5, %v2726_v0  ;;  %v2755_v25 = vrot.slane %v2752_v13, 7 }
 0x584   :  { %v2729_v20 = vrot.slane %v2728_v50, 1 }
 0x586   :  { %v2730_v60 = vadd.f32 %v2729_v20, %v2728_v50 }
 0x588   :  { %v2751_v48 = vadd.f32 %v2927_v3, %v2730_v60 }
 0x58a   :  { %v2757_v17 = vsel %vm2756_vm10, %v2755_v25, %v2751_v48 }
 0x58b   :  { %2760 = vst.msk [vmem:[%s5385_s11] sm:$0x3] %vm2759_vm14, %v2757_v17 }

</bundles_post_ra>
